<compile_context>
chip_gen: v5e
topology: v5e:2x2
jax: 0.10.0
libtpu: 0.0.40
codegen_flags: <defaults>
</compile_context>

<pallas_src>
import functools

import jax
import jax.numpy as jnp
import numpy as np
from jax.experimental import pallas as pl
from jax.experimental.pallas import tpu as pltpu


def _conv_mixer_kernel(x_ref, w_ref, b_ref, col_ref, o_ref, *, hw):
    # x_ref  : (bb, Lp, Cp) bf16   flattened H-padded images, Lp = (H+2)*W + 2
    # w_ref  : (9, Cp, Cp)  bf16   per-tap block-diagonal grouped-conv weight
    # b_ref  : (1, Cp)      f32    bias (resident)
    # col_ref: (N, 1)       int32  column index of each output pixel (resident)
    # o_ref  : (bb, N, Cp)         output block (lane-dense)
    H, W = hw
    N = H * W
    bb = x_ref.shape[0]
    Cp = x_ref.shape[-1]

    col = col_ref[...]                  # (N, 1)
    not_left = col != 0                 # mask for kw == 0 taps (needs column c-1)
    not_right = col != (W - 1)          # mask for kw == 2 taps (needs column c+1)
    bias = b_ref[...]                   # (1, Cp) f32

    for j in range(bb):                 # static unroll over images in this block
        acc = jnp.zeros((N, Cp), jnp.float32)
        for kh in range(3):
            for kw in range(3):
                start = kh * W + kw
                tap = x_ref[j, start:start + N, :]          # (N, Cp) bf16, 2D load
                if kw == 0:
                    tap = jnp.where(not_left, tap, jnp.zeros_like(tap))
                elif kw == 2:
                    tap = jnp.where(not_right, tap, jnp.zeros_like(tap))
                acc = acc + jnp.dot(tap, w_ref[kh * 3 + kw],
                                    preferred_element_type=jnp.float32)
        o_ref[j] = (acc + bias).astype(o_ref.dtype)


def _pick_batch_block(B: int, N: int) -> int:
    # Aim for ~512 output rows per grid step, but keep >= 2 grid steps when the
    # batch allows it so both v7x TensorCores get work ('parallel' grid axis).
    bb = max(1, 512 // max(N, 1))
    if B >= 2:
        bb = min(bb, max(1, B // 2))
    return max(1, min(bb, B))


@functools.partial(jax.jit, static_argnames=("hw", "num_heads", "out_dtype"))
def conv_mixer_forward(x, weight, bias, *, hw, num_heads, out_dtype=None):
    """x: (B, N, C); weight: (C, C//num_heads, 3, 3); bias: (C,)."""
    B, N, C = x.shape
    H, W = hw
    assert N == H * W, "sequence length must equal H*W"
    assert C % num_heads == 0, "dim must be divisible by num_heads"
    cg = C // num_heads
    Cp = ((C + 127) // 128) * 128                 # lane-dense channel width
    out_dtype = x.dtype if out_dtype is None else out_dtype

    # ---- weight: grouped (C, cg, 3, 3) -> per-tap block-diagonal (9, Cp, Cp) bf16 ----
    # dense[kh, kw, ci, co] = weight[co, ci - g*cg, kh, kw] iff ci in group g = co // cg
    w_g = weight.reshape(num_heads, cg, cg, 3, 3)          # [g, co_in_g, ci_in_g, kh, kw]
    eye = jnp.eye(num_heads, dtype=weight.dtype)
    dense6 = jnp.einsum("gh,gabkw->kwgbha", eye, w_g)      # (3, 3, g, ci_g, h, co_g)
    w_dense = dense6.reshape(3, 3, C, C)
    if Cp != C:
        w_dense = jnp.pad(w_dense, ((0, 0), (0, 0), (0, Cp - C), (0, Cp - C)))
    w_taps = w_dense.reshape(9, Cp, Cp).astype(jnp.bfloat16)

    bias_p = bias.astype(jnp.float32)
    if Cp != C:
        bias_p = jnp.pad(bias_p, (0, Cp - C))
    bias_p = bias_p.reshape(1, Cp)

    # Column index of each output pixel (for left/right edge masks), resident in VMEM.
    col_ids = (jnp.arange(N, dtype=jnp.int32) % W).reshape(N, 1)

    # ---- input: (B, N, C) -> bf16, channel pad, pad H rows, flatten, +1 guards ----
    x_img = x.reshape(B, H, W, C).astype(jnp.bfloat16)     # cast BEFORE padding
    if Cp != C:
        x_img = jnp.pad(x_img, ((0, 0), (0, 0), (0, 0), (0, Cp - C)))
    x_img = jnp.pad(x_img, ((0, 0), (1, 1), (0, 0), (0, 0)))          # H pad only
    x_flat = x_img.reshape(B, (H + 2) * W, Cp)
    x_flat = jnp.pad(x_flat, ((0, 0), (1, 1), (0, 0)))                # +-1 guard rows
    Lp = (H + 2) * W + 2

    bb = _pick_batch_block(B, N)
    B_pad = pl.cdiv(B, bb) * bb
    if B_pad != B:
        x_flat = jnp.pad(x_flat, ((0, B_pad - B), (0, 0), (0, 0)))
    grid = (B_pad // bb,)

    # ---- VMEM budget from actual buffers (double-buffered), capped for v7x ----
    out_itemsize = jnp.dtype(out_dtype).itemsize
    in_bytes = bb * Lp * Cp * 2
    out_bytes = bb * N * Cp * out_itemsize
    w_bytes = 9 * Cp * Cp * 2 + Cp * 4 + N * 4
    scratch_bytes = 8 * N * Cp                                         # f32 acc + taps
    vmem_limit = 2 * (in_bytes + out_bytes + w_bytes) + 4 * scratch_bytes + (4 << 20)
    vmem_limit = int(min(max(vmem_limit, 16 << 20), 48 << 20))

    kernel = functools.partial(_conv_mixer_kernel, hw=(H, W))

    out = pl.pallas_call(
        kernel,
        out_shape=jax.ShapeDtypeStruct((B_pad, N, Cp), out_dtype),
        grid_spec=pltpu.PrefetchScalarGridSpec(
            num_scalar_prefetch=0,
            grid=grid,
            in_specs=[
                pl.BlockSpec((bb, Lp, Cp), lambda i: (i, 0, 0)),   # image block
                pl.BlockSpec((9, Cp, Cp), lambda i: (0, 0, 0)),    # resident weight
                pl.BlockSpec((1, Cp), lambda i: (0, 0)),           # resident bias
                pl.BlockSpec((N, 1), lambda i: (0, 0)),            # resident col ids
            ],
            out_specs=pl.BlockSpec((bb, N, Cp), lambda i: (i, 0, 0)),
        ),
        compiler_params=pltpu.CompilerParams(
            dimension_semantics=("parallel",),
            vmem_limit_bytes=vmem_limit,
        ),
    )(x_flat, w_taps, bias_p, col_ids)

    if B_pad != B or Cp != C:
        out = out[:B, :, :C]
    return out


def _reference(x, weight, bias, hw, num_heads):
    # Pure-JAX f32 reference using lax grouped conv, NHWC/HWIO.
    B, N, C = x.shape
    H, W = hw
    x_nhwc = x.reshape(B, H, W, C)
    k_hwio = jnp.transpose(weight, (2, 3, 1, 0))  # (3, 3, C//groups, C)
    y = jax.lax.conv_general_dilated(
        x_nhwc, k_hwio, window_strides=(1, 1), padding="SAME",
        dimension_numbers=("NHWC", "HWIO", "NHWC"),
        feature_group_count=num_heads)
    y = y + bias.reshape(1, 1, 1, C)
    return y.reshape(B, N, C)


if __name__ == "__main__":
    B, dim, num_heads = 2, 32, 8
    HW = (8, 10)
    N = HW[0] * HW[1]
    cg = dim // num_heads

    key = jax.random.PRNGKey(0)
    kx, kw, kb = jax.random.split(key, 3)

    # Deterministic param init (mimics kaiming_normal_ fan_out / default bias init).
    fan_out = dim * 3 * 3
    fan_in = cg * 3 * 3
    weight = jax.random.normal(kw, (dim, cg, 3, 3), jnp.float32) * np.sqrt(2.0 / fan_out)
    bias = jax.random.uniform(kb, (dim,), jnp.float32,
                              minval=-1.0 / np.sqrt(fan_in), maxval=1.0 / np.sqrt(fan_in))

    x = jax.random.normal(kx, (B, N, dim), jnp.float32)

    out = conv_mixer_forward(x, weight, bias, hw=HW, num_heads=num_heads)
    out = jax.block_until_ready(out)

    ref = _reference(x, weight, bias, HW, num_heads)
    # bf16 MXU inputs (f32 accumulation) -> tolerance consistent with bf16 mantissa.
    np.testing.assert_allclose(np.asarray(out), np.asarray(ref), rtol=2e-2, atol=2e-2)

    print("KERNEL_OK")
</pallas_src>

<mosaic_0001>
module attributes {stable_mosaic.version = 11 : i64} {
  func.func @_conv_mixer_kernel(%arg0: i32, %arg1: memref<1x102x128xbf16, #tpu.memory_space<vmem>>, %arg2: memref<9x128x128xbf16, #tpu.memory_space<vmem>>, %arg3: memref<1x128xf32, #tpu.memory_space<vmem>>, %arg4: memref<80x1xi32, #tpu.memory_space<vmem>>, %arg5: memref<1x80x128xf32, #tpu.memory_space<vmem>>) attributes {dimension_semantics = [#tpu.dimension_semantics<parallel>], iteration_bounds = array<i64: 2>, scalar_prefetch = 0 : i64, scratch_operands = 0 : i64, tpu.core_type = #tpu.core_type<tc>, window_params = [{transform_indices = @transform_0, window_bounds = array<i64: 1, 102, 128>}, {pipeline_mode = #tpu.pipeline_mode<synchronous>, transform_indices = @transform_1, window_bounds = array<i64: 9, 128, 128>}, {pipeline_mode = #tpu.pipeline_mode<synchronous>, transform_indices = @transform_2, window_bounds = array<i64: 1, 128>}, {pipeline_mode = #tpu.pipeline_mode<synchronous>, transform_indices = @transform_3, window_bounds = array<i64: 80, 1>}, {transform_indices = @transform_4, window_bounds = array<i64: 1, 80, 128>}]} {
    %c0 = arith.constant 0 : index
    %c0_0 = arith.constant 0 : index
    %0 = vector.load %arg4[%c0, %c0_0] : memref<80x1xi32, #tpu.memory_space<vmem>>, vector<80x1xi32>
    %c0_i32 = arith.constant 0 : i32
    %1 = vector.broadcast %c0_i32 : i32 to vector<80x1xi32>
    %2 = arith.cmpi ne, %0, %1 : vector<80x1xi32>
    %c9_i32 = arith.constant 9 : i32
    %3 = vector.broadcast %c9_i32 : i32 to vector<80x1xi32>
    %4 = arith.cmpi ne, %0, %3 : vector<80x1xi32>
    %c0_1 = arith.constant 0 : index
    %c0_2 = arith.constant 0 : index
    %5 = vector.load %arg3[%c0_1, %c0_2] : memref<1x128xf32, #tpu.memory_space<vmem>>, vector<1x128xf32>
    %cst = arith.constant 0.000000e+00 : f32
    %6 = vector.broadcast %cst : f32 to vector<80x128xf32>
    %c0_3 = arith.constant 0 : index
    %c0_4 = arith.constant 0 : index
    %c0_5 = arith.constant 0 : index
    %7 = vector.load %arg1[%c0_3, %c0_4, %c0_5] : memref<1x102x128xbf16, #tpu.memory_space<vmem>>, vector<1x80x128xbf16>
    %8 = vector.shape_cast %7 : vector<1x80x128xbf16> to vector<80x128xbf16>
    %cst_6 = arith.constant 0.000000e+00 : bf16
    %9 = vector.broadcast %cst_6 : bf16 to vector<80x128xbf16>
    %10 = vector.shape_cast %2 : vector<80x1xi1> to vector<80x1xi1>
    %11 = vector.broadcast %10 : vector<80x1xi1> to vector<80x128xi1>
    %12 = arith.select %11, %8, %9 : vector<80x128xi1>, vector<80x128xbf16>
    %c0_7 = arith.constant 0 : index
    %c0_8 = arith.constant 0 : index
    %c0_9 = arith.constant 0 : index
    %13 = vector.load %arg2[%c0_7, %c0_8, %c0_9] : memref<9x128x128xbf16, #tpu.memory_space<vmem>>, vector<1x128x128xbf16>
    %14 = vector.shape_cast %13 : vector<1x128x128xbf16> to vector<128x128xbf16>
    %cst_10 = arith.constant dense<0.000000e+00> : vector<80x128xf32>
    %15 = tpu.matmul %12, %14, %cst_10 {dimension_numbers = #tpu.dot_dimension_numbers<[1], [0], [0], [1], [0, 0, 1, 1], [], []>} : vector<80x128xbf16>, vector<128x128xbf16>, vector<80x128xf32> -> vector<80x128xf32>
    %16 = arith.addf %6, %15 : vector<80x128xf32>
    %c0_11 = arith.constant 0 : index
    %c1 = arith.constant 1 : index
    %c0_12 = arith.constant 0 : index
    %17 = vector.load %arg1[%c0_11, %c1, %c0_12] : memref<1x102x128xbf16, #tpu.memory_space<vmem>>, vector<1x80x128xbf16>
    %18 = vector.shape_cast %17 : vector<1x80x128xbf16> to vector<80x128xbf16>
    %c1_13 = arith.constant 1 : index
    %c0_14 = arith.constant 0 : index
    %c0_15 = arith.constant 0 : index
    %19 = vector.load %arg2[%c1_13, %c0_14, %c0_15] : memref<9x128x128xbf16, #tpu.memory_space<vmem>>, vector<1x128x128xbf16>
    %20 = vector.shape_cast %19 : vector<1x128x128xbf16> to vector<128x128xbf16>
    %cst_16 = arith.constant dense<0.000000e+00> : vector<80x128xf32>
    %21 = tpu.matmul %18, %20, %cst_16 {dimension_numbers = #tpu.dot_dimension_numbers<[1], [0], [0], [1], [0, 0, 1, 1], [], []>} : vector<80x128xbf16>, vector<128x128xbf16>, vector<80x128xf32> -> vector<80x128xf32>
    %22 = arith.addf %16, %21 : vector<80x128xf32>
    %c0_17 = arith.constant 0 : index
    %c2 = arith.constant 2 : index
    %c0_18 = arith.constant 0 : index
    %23 = vector.load %arg1[%c0_17, %c2, %c0_18] : memref<1x102x128xbf16, #tpu.memory_space<vmem>>, vector<1x80x128xbf16>
    %24 = vector.shape_cast %23 : vector<1x80x128xbf16> to vector<80x128xbf16>
    %cst_19 = arith.constant 0.000000e+00 : bf16
    %25 = vector.broadcast %cst_19 : bf16 to vector<80x128xbf16>
    %26 = vector.shape_cast %4 : vector<80x1xi1> to vector<80x1xi1>
    %27 = vector.broadcast %26 : vector<80x1xi1> to vector<80x128xi1>
    %28 = arith.select %27, %24, %25 : vector<80x128xi1>, vector<80x128xbf16>
    %c2_20 = arith.constant 2 : index
    %c0_21 = arith.constant 0 : index
    %c0_22 = arith.constant 0 : index
    %29 = vector.load %arg2[%c2_20, %c0_21, %c0_22] : memref<9x128x128xbf16, #tpu.memory_space<vmem>>, vector<1x128x128xbf16>
    %30 = vector.shape_cast %29 : vector<1x128x128xbf16> to vector<128x128xbf16>
    %cst_23 = arith.constant dense<0.000000e+00> : vector<80x128xf32>
    %31 = tpu.matmul %28, %30, %cst_23 {dimension_numbers = #tpu.dot_dimension_numbers<[1], [0], [0], [1], [0, 0, 1, 1], [], []>} : vector<80x128xbf16>, vector<128x128xbf16>, vector<80x128xf32> -> vector<80x128xf32>
    %32 = arith.addf %22, %31 : vector<80x128xf32>
    %c0_24 = arith.constant 0 : index
    %c10 = arith.constant 10 : index
    %c0_25 = arith.constant 0 : index
    %33 = vector.load %arg1[%c0_24, %c10, %c0_25] : memref<1x102x128xbf16, #tpu.memory_space<vmem>>, vector<1x80x128xbf16>
    %34 = vector.shape_cast %33 : vector<1x80x128xbf16> to vector<80x128xbf16>
    %cst_26 = arith.constant 0.000000e+00 : bf16
    %35 = vector.broadcast %cst_26 : bf16 to vector<80x128xbf16>
    %36 = vector.shape_cast %2 : vector<80x1xi1> to vector<80x1xi1>
    %37 = vector.broadcast %36 : vector<80x1xi1> to vector<80x128xi1>
    %38 = arith.select %37, %34, %35 : vector<80x128xi1>, vector<80x128xbf16>
    %c3 = arith.constant 3 : index
    %c0_27 = arith.constant 0 : index
    %c0_28 = arith.constant 0 : index
    %39 = vector.load %arg2[%c3, %c0_27, %c0_28] : memref<9x128x128xbf16, #tpu.memory_space<vmem>>, vector<1x128x128xbf16>
    %40 = vector.shape_cast %39 : vector<1x128x128xbf16> to vector<128x128xbf16>
    %cst_29 = arith.constant dense<0.000000e+00> : vector<80x128xf32>
    %41 = tpu.matmul %38, %40, %cst_29 {dimension_numbers = #tpu.dot_dimension_numbers<[1], [0], [0], [1], [0, 0, 1, 1], [], []>} : vector<80x128xbf16>, vector<128x128xbf16>, vector<80x128xf32> -> vector<80x128xf32>
    %42 = arith.addf %32, %41 : vector<80x128xf32>
    %c0_30 = arith.constant 0 : index
    %c11 = arith.constant 11 : index
    %c0_31 = arith.constant 0 : index
    %43 = vector.load %arg1[%c0_30, %c11, %c0_31] : memref<1x102x128xbf16, #tpu.memory_space<vmem>>, vector<1x80x128xbf16>
    %44 = vector.shape_cast %43 : vector<1x80x128xbf16> to vector<80x128xbf16>
    %c4 = arith.constant 4 : index
    %c0_32 = arith.constant 0 : index
    %c0_33 = arith.constant 0 : index
    %45 = vector.load %arg2[%c4, %c0_32, %c0_33] : memref<9x128x128xbf16, #tpu.memory_space<vmem>>, vector<1x128x128xbf16>
    %46 = vector.shape_cast %45 : vector<1x128x128xbf16> to vector<128x128xbf16>
    %cst_34 = arith.constant dense<0.000000e+00> : vector<80x128xf32>
    %47 = tpu.matmul %44, %46, %cst_34 {dimension_numbers = #tpu.dot_dimension_numbers<[1], [0], [0], [1], [0, 0, 1, 1], [], []>} : vector<80x128xbf16>, vector<128x128xbf16>, vector<80x128xf32> -> vector<80x128xf32>
    %48 = arith.addf %42, %47 : vector<80x128xf32>
    %c0_35 = arith.constant 0 : index
    %c12 = arith.constant 12 : index
    %c0_36 = arith.constant 0 : index
    %49 = vector.load %arg1[%c0_35, %c12, %c0_36] : memref<1x102x128xbf16, #tpu.memory_space<vmem>>, vector<1x80x128xbf16>
    %50 = vector.shape_cast %49 : vector<1x80x128xbf16> to vector<80x128xbf16>
    %cst_37 = arith.constant 0.000000e+00 : bf16
    %51 = vector.broadcast %cst_37 : bf16 to vector<80x128xbf16>
    %52 = vector.shape_cast %4 : vector<80x1xi1> to vector<80x1xi1>
    %53 = vector.broadcast %52 : vector<80x1xi1> to vector<80x128xi1>
    %54 = arith.select %53, %50, %51 : vector<80x128xi1>, vector<80x128xbf16>
    %c5 = arith.constant 5 : index
    %c0_38 = arith.constant 0 : index
    %c0_39 = arith.constant 0 : index
    %55 = vector.load %arg2[%c5, %c0_38, %c0_39] : memref<9x128x128xbf16, #tpu.memory_space<vmem>>, vector<1x128x128xbf16>
    %56 = vector.shape_cast %55 : vector<1x128x128xbf16> to vector<128x128xbf16>
    %cst_40 = arith.constant dense<0.000000e+00> : vector<80x128xf32>
    %57 = tpu.matmul %54, %56, %cst_40 {dimension_numbers = #tpu.dot_dimension_numbers<[1], [0], [0], [1], [0, 0, 1, 1], [], []>} : vector<80x128xbf16>, vector<128x128xbf16>, vector<80x128xf32> -> vector<80x128xf32>
    %58 = arith.addf %48, %57 : vector<80x128xf32>
    %c0_41 = arith.constant 0 : index
    %c20 = arith.constant 20 : index
    %c0_42 = arith.constant 0 : index
    %59 = vector.load %arg1[%c0_41, %c20, %c0_42] : memref<1x102x128xbf16, #tpu.memory_space<vmem>>, vector<1x80x128xbf16>
    %60 = vector.shape_cast %59 : vector<1x80x128xbf16> to vector<80x128xbf16>
    %cst_43 = arith.constant 0.000000e+00 : bf16
    %61 = vector.broadcast %cst_43 : bf16 to vector<80x128xbf16>
    %62 = vector.shape_cast %2 : vector<80x1xi1> to vector<80x1xi1>
    %63 = vector.broadcast %62 : vector<80x1xi1> to vector<80x128xi1>
    %64 = arith.select %63, %60, %61 : vector<80x128xi1>, vector<80x128xbf16>
    %c6 = arith.constant 6 : index
    %c0_44 = arith.constant 0 : index
    %c0_45 = arith.constant 0 : index
    %65 = vector.load %arg2[%c6, %c0_44, %c0_45] : memref<9x128x128xbf16, #tpu.memory_space<vmem>>, vector<1x128x128xbf16>
    %66 = vector.shape_cast %65 : vector<1x128x128xbf16> to vector<128x128xbf16>
    %cst_46 = arith.constant dense<0.000000e+00> : vector<80x128xf32>
    %67 = tpu.matmul %64, %66, %cst_46 {dimension_numbers = #tpu.dot_dimension_numbers<[1], [0], [0], [1], [0, 0, 1, 1], [], []>} : vector<80x128xbf16>, vector<128x128xbf16>, vector<80x128xf32> -> vector<80x128xf32>
    %68 = arith.addf %58, %67 : vector<80x128xf32>
    %c0_47 = arith.constant 0 : index
    %c21 = arith.constant 21 : index
    %c0_48 = arith.constant 0 : index
    %69 = vector.load %arg1[%c0_47, %c21, %c0_48] : memref<1x102x128xbf16, #tpu.memory_space<vmem>>, vector<1x80x128xbf16>
    %70 = vector.shape_cast %69 : vector<1x80x128xbf16> to vector<80x128xbf16>
    %c7 = arith.constant 7 : index
    %c0_49 = arith.constant 0 : index
    %c0_50 = arith.constant 0 : index
    %71 = vector.load %arg2[%c7, %c0_49, %c0_50] : memref<9x128x128xbf16, #tpu.memory_space<vmem>>, vector<1x128x128xbf16>
    %72 = vector.shape_cast %71 : vector<1x128x128xbf16> to vector<128x128xbf16>
    %cst_51 = arith.constant dense<0.000000e+00> : vector<80x128xf32>
    %73 = tpu.matmul %70, %72, %cst_51 {dimension_numbers = #tpu.dot_dimension_numbers<[1], [0], [0], [1], [0, 0, 1, 1], [], []>} : vector<80x128xbf16>, vector<128x128xbf16>, vector<80x128xf32> -> vector<80x128xf32>
    %74 = arith.addf %68, %73 : vector<80x128xf32>
    %c0_52 = arith.constant 0 : index
    %c22 = arith.constant 22 : index
    %c0_53 = arith.constant 0 : index
    %75 = vector.load %arg1[%c0_52, %c22, %c0_53] : memref<1x102x128xbf16, #tpu.memory_space<vmem>>, vector<1x80x128xbf16>
    %76 = vector.shape_cast %75 : vector<1x80x128xbf16> to vector<80x128xbf16>
    %cst_54 = arith.constant 0.000000e+00 : bf16
    %77 = vector.broadcast %cst_54 : bf16 to vector<80x128xbf16>
    %78 = vector.shape_cast %4 : vector<80x1xi1> to vector<80x1xi1>
    %79 = vector.broadcast %78 : vector<80x1xi1> to vector<80x128xi1>
    %80 = arith.select %79, %76, %77 : vector<80x128xi1>, vector<80x128xbf16>
    %c8 = arith.constant 8 : index
    %c0_55 = arith.constant 0 : index
    %c0_56 = arith.constant 0 : index
    %81 = vector.load %arg2[%c8, %c0_55, %c0_56] : memref<9x128x128xbf16, #tpu.memory_space<vmem>>, vector<1x128x128xbf16>
    %82 = vector.shape_cast %81 : vector<1x128x128xbf16> to vector<128x128xbf16>
    %cst_57 = arith.constant dense<0.000000e+00> : vector<80x128xf32>
    %83 = tpu.matmul %80, %82, %cst_57 {dimension_numbers = #tpu.dot_dimension_numbers<[1], [0], [0], [1], [0, 0, 1, 1], [], []>} : vector<80x128xbf16>, vector<128x128xbf16>, vector<80x128xf32> -> vector<80x128xf32>
    %84 = arith.addf %74, %83 : vector<80x128xf32>
    %85 = vector.broadcast %5 : vector<1x128xf32> to vector<80x128xf32>
    %86 = arith.addf %84, %85 : vector<80x128xf32>
    %c0_58 = arith.constant 0 : index
    %c0_59 = arith.constant 0 : index
    %c0_60 = arith.constant 0 : index
    %87 = vector.load %arg5[%c0_58, %c0_59, %c0_60] : memref<1x80x128xf32, #tpu.memory_space<vmem>>, vector<1x80x128xf32>
    %88 = vector.shape_cast %87 : vector<1x80x128xf32> to vector<80x128xf32>
    %89 = vector.shape_cast %86 : vector<80x128xf32> to vector<1x80x128xf32>
    tpu.vector_store %arg5[%c0_58, %c0_59, %c0_60], %89 {strides = array<i32>} : memref<1x80x128xf32, #tpu.memory_space<vmem>>, vector<1x80x128xf32>,
    return
  }
  func.func @transform_0(%arg0: i32) -> (i32, i32, i32) {
    %c0_i32 = arith.constant 0 : i32
    %c0_i32_0 = arith.constant 0 : i32
    %c0_i32_1 = arith.constant 0 : i32
    return %arg0, %c0_i32, %c0_i32_0 : i32, i32, i32
  }
  func.func @transform_1(%arg0: i32) -> (i32, i32, i32) {
    %c0_i32 = arith.constant 0 : i32
    %c0_i32_0 = arith.constant 0 : i32
    %c0_i32_1 = arith.constant 0 : i32
    %c0_i32_2 = arith.constant 0 : i32
    return %c0_i32, %c0_i32_0, %c0_i32_1 : i32, i32, i32
  }
  func.func @transform_2(%arg0: i32) -> (i32, i32) {
    %c0_i32 = arith.constant 0 : i32
    %c0_i32_0 = arith.constant 0 : i32
    %c0_i32_1 = arith.constant 0 : i32
    return %c0_i32, %c0_i32_0 : i32, i32
  }
  func.func @transform_3(%arg0: i32) -> (i32, i32) {
    %c0_i32 = arith.constant 0 : i32
    %c0_i32_0 = arith.constant 0 : i32
    %c0_i32_1 = arith.constant 0 : i32
    return %c0_i32, %c0_i32_0 : i32, i32
  }
  func.func @transform_4(%arg0: i32) -> (i32, i32, i32) {
    %c0_i32 = arith.constant 0 : i32
    %c0_i32_0 = arith.constant 0 : i32
    %c0_i32_1 = arith.constant 0 : i32
    return %arg0, %c0_i32, %c0_i32_0 : i32, i32, i32
  }
}

</mosaic_0001>

<bundles_post_ra>
// kernel: conv_mixer_forward.1
= control target key start
LH: loop header
LB: loop body
LE: loop exit
PB: predicated region body
PF: predicated region fallthrough
CT: control target
= control target key end

     0   :  { %s3206_s15 = smov 0   ;;  %s5559_s0 = inlined_call_operand.vmem [shape: bf16[2,102,128], index: 0, kind: input, shape index: {}]   ;;  %s5560_s1 = inlined_call_operand.vmem [shape: bf16[9,128,128], index: 1, kind: input, shape index: {}]   ;;  %s5561_s2 = inlined_call_operand.vmem [shape: f32[1,128], index: 2, kind: input, shape index: {}]   ;;  %s5562_s3 = inlined_call_operand.vmem [shape: s32[80,1], index: 3, kind: input, shape index: {}]   ;;  %s5563_s4 = inlined_call_operand.vmem [shape: f32[2,80,128], index: 4, kind: output, shape index: {}]  }
   0x1 LB: > { %s2567_s16 = sadd.s32 4294967295, %s3178_s15   ;;  %p2571_p0 = scmp.ge.s32.totalorder %s3178_s15, 1  ;;  %s3178_s15 = sphi %s3206_s15, %s14_s15  }
   0x2   : > { %p162_p1 = scmp.lt.s32.totalorder %s3178_s15, 3 }
   0x4   : > { %p163_p2 = pnand %p2571_p0, %p162_p1 }
   0x6   : > { %166 = sbr.rel (%p163_p2) target bundleno = 523 (0x20b), region = 36 }
   0xb   : > { %v203_v0 = vld [vmem:[%s5562_s3 + $0x10] sm:$0xff]  ;;  %v202_v1 = vld [vmem:[%s5562_s3 + $0x8] sm:$0xff]  ;;  %v201_v2 = vld [vmem:[%s5562_s3] sm:$0xff]  ;;  %v5569_v3 = vmov 0   ;;  %p188_p3 = scmp.lt.s32.totalorder %s2567_s16, 1 }
   0xc   : > { %3168 = vset.pattern.permute.xlu2 %v5569_v3  ;;  %3167 = vset.pattern.permute.xlu1 %v5569_v3  ;;  %vm223_vm0 = vcmp.ne.s32.totalorder %v203_v0, 9  ;;  %vm212_vm1 = vcmp.ne.s32.totalorder %v202_v1, 0  ;;  %vm221_vm2 = vcmp.ne.s32.totalorder %v201_v2, 9  ;;  %v3072_v4 = vld [vmem:[%s5560_s1 + $0x78] sm:$0xff]  ;;  %v3071_v8 = vld [vmem:[%s5560_s1 + $0x70] sm:$0xff]  ;;  %vm213_vm3 = vcmp.ne.s32.totalorder %v203_v0, 0 }
   0xd   : > { %3166 = vset.pattern.permute.xlu0 %v5569_v3  ;;  %v631_v5 = vsel %vm223_vm0, 1, %v5569_v3  ;;  %v243_v6 = vsel %vm212_vm1, 1, %v5569_v3  ;;  %v629_v7 = vsel %vm221_vm2, 1, %v5569_v3  ;;  %482 = vmatpush.bf16.msra.mxu0 %v3072_v4  ;;  %vm211_vm4 = vcmp.ne.s32.totalorder %v201_v2, 0  ;;  %s6016_s16 = smov (!%p188_p3, %s2567_s16), 1  ;;  %v3070_v11 = vld [vmem:[%s5560_s1 + $0x68] sm:$0xff] }
   0xe   : > { %646 = vperm.xlu1 %3167, %v631_v5   ;;  %256 = vperm.xlu2 %3168, %v243_v6   ;;  %vm222_vm5 = vcmp.ne.s32.totalorder %v202_v1, 9  ;;  %v244_v9 = vsel %vm213_vm3, 1, %v5569_v3  ;;  %v242_v10 = vsel %vm211_vm4, 1, %v5569_v3  ;;  %v205_v13 = vld [vmem:[%s5562_s3 + $0x20] sm:$0xff]  ;;  %v204_v14 = vld [vmem:[%s5562_s3 + $0x18] sm:$0xff]  ;;  %s3155_s7 = smul.u32 52, %s6016_s16 }
   0xf   : > { %640 = vperm.xlu0 %3166, %v629_v7   ;;  %3139 = vmatpush.bf16.msra.mxu1 %v3072_v4  ;;  %v630_v12 = vsel %vm222_vm5, 1, %v5569_v3  ;;  %v3069_v15 = vld [vmem:[%s5560_s1 + $0x60] sm:$0xff]  ;;  %vm225_vm6 = vcmp.ne.s32.totalorder %v205_v13, 9  ;;  %vm214_vm7 = vcmp.ne.s32.totalorder %v204_v14, 0  ;;  %vm224_vm8 = vcmp.ne.s32.totalorder %v204_v14, 9  ;;  %v3068_v18 = vld [vmem:[%s5560_s1 + $0x58] sm:$0xff] }
  0x10   : > { %3140 = vmatpush.bf16.msra.mxu2 %v3072_v4  ;;  %s3260_s12 = scalar_lea.vmem %s5559_s0, %s3155_s7  ;;  %v633_v16 = vsel %vm225_vm6, 1, %v5569_v3  ;;  %v245_v17 = vsel %vm214_vm7, 1, %v5569_v3  ;;  %v632_v19 = vsel %vm224_vm8, 1, %v5569_v3  ;;  %v206_v21 = vld [vmem:[%s5562_s3 + $0x28] sm:$0xff]  ;;  %v3067_v22 = vld [vmem:[%s5560_s1 + $0x50] sm:$0xff]  ;;  %vm215_vm11 = vcmp.ne.s32.totalorder %v205_v13, 0 }
  0x11   : > { %483 = vmatpush.bf16.msra.mxu0 %v3071_v8  ;;  %v3060_v20 = vld [vmem:[%s3260_s12] sm:$0xff]  ;;  %vm216_vm9 = vcmp.ne.s32.totalorder %v206_v21, 0  ;;  %vm226_vm10 = vcmp.ne.s32.totalorder %v206_v21, 9  ;;  %v3276_v23 = vld [vmem:[%s3260_s12 + $0x8] sm:$0xff]  ;;  %v246_v28 = vsel %vm215_vm11, 1, %v5569_v3  ;;  %v208_v32 = vld [vmem:[%s5562_s3 + $0x38] sm:$0xff] }
  0x12   : > { %v388_v24 = vshll.u32 %v3060_v20, 16  ;;  %v247_v25 = vsel %vm216_vm9, 1, %v5569_v3  ;;  %v634_v26 = vsel %vm226_vm10, 1, %v5569_v3  ;;  %v3066_v27 = vld [vmem:[%s5560_s1 + $0x48] sm:$0xff]  ;;  %v386_v29 = vshrl.u32 %v3060_v20, 16  ;;  %v207_v33 = vld [vmem:[%s5562_s3 + $0x30] sm:$0xff] }
  0x13   : > { %3141 = vmatpush.bf16.msra.mxu1 %v3071_v8  ;;  %v393_v31 = vshll.u32 %v3276_v23, 16  ;;  %v3065_v34 = vld [vmem:[%s5560_s1 + $0x40] sm:$0xff]  ;;  %vm228_vm12 = vcmp.ne.s32.totalorder %v208_v32, 9  ;;  %vm217_vm13 = vcmp.ne.s32.totalorder %v207_v33, 0  ;;  %v3101_v37 = vld [vmem:[%s5560_s1 + $0x138] sm:$0xff]  ;;  %vm227_vm14 = vcmp.ne.s32.totalorder %v207_v33, 9 }
  0x14   : > { %3142 = vmatpush.bf16.msra.mxu2 %v3071_v8  ;;  %v390_v30 = vrot.slane %v388_v24, 1  ;;  %vm384_vm15 = vsmask.f32 7424  ;;  %v636_v38 = vsel %vm228_vm12, 1, %v5569_v3  ;;  %v248_v39 = vsel %vm217_vm13, 1, %v5569_v3  ;;  %v3100_v42 = vld [vmem:[%s5560_s1 + $0x130] sm:$0xff] }
  0x15   : > { %484 = vmatpush.bf16.msra.mxu0 %v3070_v11  ;;  %v395_v36 = vrot.slane %v393_v31, 1  ;;  %v635_v40 = vsel %vm227_vm14, 1, %v5569_v3  ;;  %v209_v43 = vld [vmem:[%s5562_s3 + $0x40] sm:$0xff]  ;;  %v3099_v44 = vld [vmem:[%s5560_s1 + $0x128] sm:$0xff]  ;;  %v3062_v45 = vld [vmem:[%s3260_s12 + $0x10] sm:$0xff]  ;;  %vm218_vm2 = vcmp.ne.s32.totalorder %v208_v32, 0 }
  0x16   : > { %259 = vperm.xlu2 %3168, %v244_v9   ;;  %253 = vperm.xlu1 %3167, %v242_v10   ;;  %v391_v35 = vor.u32 %v390_v30, %v386_v29  ;;  %vm219_vm0 = vcmp.ne.s32.totalorder %v209_v43, 0  ;;  %vm229_vm1 = vcmp.ne.s32.totalorder %v209_v43, 9  ;;  %v249_v48 = vsel %vm218_vm2, 1, %v5569_v3  ;;  %v3098_v49 = vld [vmem:[%s5560_s1 + $0x120] sm:$0xff]  ;;  %v210_v52 = vld [vmem:[%s5562_s3 + $0x48] sm:$0xff]  ;;  %v3097_v55 = vld [vmem:[%s5560_s1 + $0x118] sm:$0xff] }
  0x17   : > { %643 = vperm.xlu0 %3166, %v630_v12   ;;  %3143 = vmatpush.bf16.msra.mxu1 %v3070_v11  ;;  %v250_v46 = vsel %vm219_vm0, 1, %v5569_v3  ;;  %v637_v47 = vsel %vm229_vm1, 1, %v5569_v3  ;;  %v397_v50 = vshrl.u32 %v3276_v23, 16  ;;  %v401_v51 = vshll.u32 %v3062_v45, 16  ;;  %v2788_v56 = vld [vmem:[%s3260_s12 + $0x4] sm:$0xe] }
  0x18   : > { %3144 = vmatpush.bf16.msra.mxu2 %v3070_v11  ;;  %v396_v41 = vsel %vm384_vm15, %v391_v35, %v395_v36  ;;  %vm220_vm3 = vcmp.ne.s32.totalorder %v210_v52, 0  ;;  %vm230_vm4 = vcmp.ne.s32.totalorder %v210_v52, 9  ;;  %v3081_v57 = vld [vmem:[%s3260_s12 + $0x4] sm:$0xf0]  ;;  %v3096_v61 = vld [vmem:[%s5560_s1 + $0x110] sm:$0xff]  ;;  %v3094_v6 = vld [vmem:[%s5560_s1 + $0x100] sm:$0xff] }
  0x19   : > { %485 = vmatpush.bf16.msra.mxu0 %v3069_v15  ;;  %v399_v53 = vor.u32 %v397_v50, %v395_v36  ;;  %v403_v54 = vrot.slane %v401_v51, 1  ;;  %v251_v58 = vsel %vm220_vm3, 1, %v5569_v3  ;;  %v638_v59 = vsel %vm230_vm4, 1, %v5569_v3  ;;  %v3082_v62 = vld [vmem:[%s3260_s12 + $0xc] sm:$0xff]  ;;  %v3063_v13 = vld [vmem:[%s3260_s12 + $0x18] sm:$0xff]  ;;  %v3056_v31 = vld [vmem:[%s5560_s1 + $0x20] sm:$0xff] }
  0x1a   : > { %v2789_v63 = vor.u32 %v3081_v57, %v2788_v56  ;;  %v3095_v0 = vld [vmem:[%s5560_s1 + $0x108] sm:$0xff]  ;;  %v1320_v4 = vshrl.u32 %v3082_v62, 16  ;;  %v1323_v5 = vshll.u32 %v3082_v62, 16  ;;  %vm1310_vm5 = vsmask.f32 6400  ;;  %v3084_v30 = vld [vmem:[%s3260_s12 + $0x1c] sm:$0xff] }
  0x1b   : > { %3145 = vmatpush.bf16.msra.mxu1 %v3069_v15  ;;  %v404_v60 = vsel %vm384_vm15, %v399_v53, %v403_v54  ;;  %v3064_v32 = vld [vmem:[%s3260_s12 + $0x20] sm:$0xff]  ;;  %v1338_v33 = vshrl.u32 %v3084_v30, 16  ;;  %v413_v35 = vshrl.u32 %v3063_v13, 16  ;;  %v3080_v43 = vld [vmem:[%s5560_s1 + $0xb8] sm:$0xff]  ;;  %v3079_v51 = vld [vmem:[%s5560_s1 + $0xb0] sm:$0xff]  ;;  %vm1462_vm8 = vcmask 1041408  }
  0x1c   : > { %3146 = vmatpush.bf16.msra.mxu2 %v3069_v15  ;;  %v1312_v1 = vshrl.u32 %v2789_v63, 16  ;;  %v1315_v2 = vshll.u32 %v2789_v63, 16  ;;  %v1322_v9 = vrot.slane %v1320_v4, 1  ;;  %v1325_v10 = vrot.slane %v1323_v5, 2  ;;  %v3083_v15 = vld [vmem:[%s3260_s12 + $0x14] sm:$0xff] }
  0x1d   : > { %486 = vmatpush.bf16.msra.mxu0 %v3068_v18  ;;  %v1329_v20 = vshrl.u32 %v3083_v15, 16  ;;  %v1332_v21 = vshll.u32 %v3083_v15, 16  ;;  %v417_v36 = vshll.u32 %v3064_v32, 16  ;;  %v3092_v52 = vld [vmem:[%s5560_s1 + $0xf0] sm:$0xff]  ;;  %vm1463_vm9 = vcmask 1045508   ;;  %v3091_v15 = vld [vmem:[%s5560_s1 + $0xe8] sm:$0xff] }
  0x1e   : > { %652 = vperm.xlu2 %3168, %v633_v16   ;;  %262 = vperm.xlu1 %3167, %v245_v17   ;;  %v1314_v7 = vrot.slane %v1312_v1, 1  ;;  %v1317_v8 = vrot.slane %v1315_v2, 2  ;;  %v1326_v12 = vor.u32 %v1325_v10, %v1322_v9  ;;  %v405_v16 = vshrl.u32 %v3062_v45, 16  ;;  %v3138_v45 = vld [vmem:[%s5560_s1 + $0x238] sm:$0xff]  ;;  %vm3399_vm12 = vmor %vm1462_vm8, %vm1463_vm9  ;;  %v3053_v10 = vld [vmem:[%s5560_s1 + $0x8] sm:$0xff] }
  0x1f   : > { %649 = vperm.xlu0 %3166, %v632_v19   ;;  %3147 = vmatpush.bf16.msra.mxu1 %v3068_v18  ;;  %v409_v17 = vshll.u32 %v3063_v13, 16  ;;  %v1331_v24 = vrot.slane %v1329_v20, 1  ;;  %v5626_v63 = vmov 0  ;;  %v1264_v20 = vld [vmem:[%s3260_s12 + $0x2c] sm:$0x3]  ;;  %vm700_vm8 = vcmask 1044484  }
  0x20   : > { %3148 = vmatpush.bf16.msra.mxu2 %v3068_v18  ;;  %v1318_v11 = vor.u32 %v1317_v8, %v1314_v7  ;;  %v407_v18 = vor.u32 %v405_v16, %v403_v54  ;;  %v3085_v54 = vld [vmem:[%s3260_s12 + $0x24] sm:$0xff]  ;;  %v5627_v63 = vsel %vm3399_vm12, 4294967295, %v5626_v63  ;;  %v421_v7 = vshrl.u32 %v3064_v32, 16 }
  0x21   : > { %487 = vmatpush.bf16.msra.mxu0 %v3067_v22  ;;  %v411_v19 = vrot.slane %v409_v17, 1  ;;  %v1347_v57 = vshrl.u32 %v3085_v54, 16  ;;  %5628 = vst [vmem:[#allocation2_spill] sm:$0xff] %v5627_v63  ;;  %v3136_v16 = vld [vmem:[%s5560_s1 + $0x228] sm:$0xff] }
  0x22   : > { %v1327_v14 = vsel %vm1310_vm5, %v1318_v11, %v1326_v12 }
  0x23   : > { %3149 = vmatpush.bf16.msra.mxu1 %v3067_v22  ;;  %v412_v23 = vsel %vm384_vm15, %v407_v18, %v411_v19  ;;  %v1349_v4 = vrot.slane %v1347_v57, 1  ;;  %v3052_v18 = vld [vmem:[%s5560_s1] sm:$0xff] }
  0x24   : > { %3150 = vmatpush.bf16.msra.mxu2 %v3067_v22  ;;  %v3059_v22 = vld [vmem:[%s5560_s1 + $0x38] sm:$0xff] }
  0x25   : > { %488 = vmatpush.bf16.msra.mxu0 %v3066_v27 }
  0x26   : > { %268 = vperm.xlu2 %3168, %v247_v25   ;;  %655 = vperm.xlu1 %3167, %v634_v26   ;;  %v1334_v25 = vrot.slane %v1332_v21, 2  ;;  %v3058_v26 = vld [vmem:[%s5560_s1 + $0x30] sm:$0xff]  ;;  %v3077_v21 = vld [vmem:[%s5560_s1 + $0xa0] sm:$0xff] }
  0x27   : > { %265 = vperm.xlu0 %3166, %v246_v28   ;;  %3151 = vmatpush.bf16.msra.mxu1 %v3066_v27  ;;  %v3057_v28 = vld [vmem:[%s5560_s1 + $0x28] sm:$0xff] }
  0x28   : > { %3152 = vmatpush.bf16.msra.mxu2 %v3066_v27  ;;  %v1335_v27 = vor.u32 %v1334_v25, %v1331_v24 }
  0x29   : > { %489 = vmatpush.bf16.msra.mxu0 %v3065_v34 }
  0x2a   : > { %v1336_v29 = vsel %vm1310_vm5, %v1326_v12, %v1335_v27 }
  0x2b   : > { %3153 = vmatpush.bf16.msra.mxu1 %v3065_v34 }
  0x2c   : > { %3154 = vmatpush.bf16.msra.mxu2 %v3065_v34  ;;  %490 = vmatmul.bf16.vlgmr.msra.gmra.mxu0 %v396_v41  ;;  %v1341_v34 = vshll.u32 %v3084_v30, 16  ;;  %v3135_v30 = vld [vmem:[%s5560_s1 + $0x220] sm:$0xff] }
  0x2d   : > { %1417 = vmatpush.bf16.msrb.mxu0 %v3101_v37  ;;  %v415_v37 = vor.u32 %v413_v35, %v411_v19 }
  0x2e   : > { %661 = vperm.xlu2 %3168, %v636_v38   ;;  %271 = vperm.xlu1 %3167, %v248_v39   ;;  %v419_v38 = vrot.slane %v417_v36, 1  ;;  %v1340_v39 = vrot.slane %v1338_v33, 1  ;;  %v3076_v33 = vld [vmem:[%s5560_s1 + $0x98] sm:$0xff] }
  0x2f   : > { %658 = vperm.xlu0 %3166, %v635_v40   ;;  %500 = vmatmul.bf16.vlgmr.msra.gmra.mxu1 %v412_v23  ;;  %v1343_v40 = vrot.slane %v1341_v34, 2  ;;  %v1303_v23 = vunpack.c.l.b16 %v1264_v20  ;;  %v3089_v34 = vld [vmem:[%s5560_s1 + $0xd8] sm:$0xff] }
  0x30   : > { %594 = vmatpush.bf16.msrb.mxu1 %v3059_v22  ;;  %v420_v41 = vsel %vm384_vm15, %v415_v37, %v419_v38  ;;  %929 = vmatpush.bf16.msrb.mxu2 %v3080_v43  ;;  %v423_v12 = vor.u32 %v421_v7, %v419_v38  ;;  %v3090_v22 = vld [vmem:[%s5560_s1 + $0xe0] sm:$0xff]  ;;  %v3134_v36 = vld [vmem:[%s5560_s1 + $0x218] sm:$0xff] }
  0x31   : > { %1418 = vmatpush.bf16.msrb.mxu0 %v3100_v42  ;;  %v3055_v42 = vld [vmem:[%s5560_s1 + $0x18] sm:$0xff]  ;;  %v1309_v24 = vpack.c.b16 %v1303_v23, %v1303_v23 }
  0x34   : > { %595 = vmatpush.bf16.msrb.mxu1 %v3058_v26  ;;  %930 = vmatpush.bf16.msrb.mxu2 %v3079_v51 }
  0x35   : > { %1419 = vmatpush.bf16.msrb.mxu0 %v3099_v44  ;;  %v3093_v44 = vld [vmem:[%s5560_s1 + $0xf8] sm:$0xff] }
  0x36   : > { %277 = vperm.xlu2 %3168, %v250_v46   ;;  %664 = vperm.xlu1 %3167, %v637_v47   ;;  %v1344_v47 = vor.u32 %v1343_v40, %v1340_v39  ;;  %v3075_v40 = vld [vmem:[%s5560_s1 + $0x90] sm:$0xff] }
  0x37   : > { %274 = vperm.xlu0 %3166, %v249_v48   ;;  %v3054_v48 = vld [vmem:[%s5560_s1 + $0x10] sm:$0xff]  ;;  %1220 = vmatpush.bf16.msra.mxu3 %v3093_v44 }
  0x38   : > { %596 = vmatpush.bf16.msrb.mxu1 %v3057_v28  ;;  %v1345_v53 = vsel %vm1310_vm5, %v1335_v27, %v1344_v47  ;;  %v1356_v27 = vshrl.u32 %v1309_v24, 16  ;;  %v1359_v28 = vshll.u32 %v1309_v24, 16  ;;  %v237_v24 = vld [vmem:[%s3260_s12 + $0x14] sm:$0xf] }
  0x39   : > { %1420 = vmatpush.bf16.msrb.mxu0 %v3098_v49 }
  0x3a   : > { %v1361_v32 = vrot.slane %v1359_v28, 2 }
  0x3b   : > { %1221 = vmatpush.bf16.msra.mxu3 %v3092_v52  ;;  %v232_v52 = vld [vmem:[%s3260_s12] sm:$0xf] }
  0x3c   : > { %495 = vmatmul.bf16.gmra.mxu0 %v404_v60  ;;  %597 = vmatpush.bf16.msrb.mxu1 %v3056_v31  ;;  %v1358_v31 = vrot.slane %v1356_v27, 1 }
  0x3d   : > { %1421 = vmatpush.bf16.msrb.mxu0 %v3097_v55 }
  0x3e   : > { %280 = vperm.xlu1 %3167, %v251_v58   ;;  %v1350_v58 = vshll.u32 %v3085_v54, 16  ;;  %v1362_v35 = vor.u32 %v1361_v32, %v1358_v31  ;;  %v234_v54 = vld [vmem:[%s3260_s12 + $0x8] sm:$0xf] }
  0x3f   : > { %667 = vperm.xlu0 %3166, %v638_v59   ;;  %505 = vmatmul.bf16.gmra.mxu1 %v420_v41  ;;  %v338_v59 = vld [vmem:[%s3260_s12 + $0x28] sm:$0x1]  ;;  %v3088_v41 = vld [vmem:[%s5560_s1 + $0xd0] sm:$0xff] }
  0x40   : > { %598 = vmatpush.bf16.msrb.mxu1 %v3055_v42  ;;  %v377_v60 = vunpack.c.l.b16 %v338_v59  ;;  %v1352_v5 = vrot.slane %v1350_v58, 2  ;;  %1222 = vmatpush.bf16.msra.mxu3 %v3091_v15  ;;  %v3074_v58 = vld [vmem:[%s5560_s1 + $0x88] sm:$0xff] }
  0x41   : > { %1422 = vmatpush.bf16.msrb.mxu0 %v3096_v61  ;;  %v3087_v59 = vld [vmem:[%s5560_s1 + $0xc8] sm:$0xff] }
  0x42   : > { %v383_v1 = vpack.c.b16 %v377_v60, %v377_v60  ;;  %v1353_v11 = vor.u32 %v1352_v5, %v1349_v4 }
  0x44   : > { %599 = vmatpush.bf16.msrb.mxu1 %v3054_v48  ;;  %v425_v8 = vshll.u32 %v383_v1, 16  ;;  %v1354_v19 = vsel %vm1310_vm5, %v1344_v47, %v1353_v11  ;;  %1223 = vmatpush.bf16.msra.mxu3 %v3090_v22  ;;  %v1363_v43 = vsel %vm1310_vm5, %v1353_v11, %v1362_v35 }
  0x45   : > { %1423 = vmatpush.bf16.msrb.mxu0 %v3095_v0 }
  0x46   : > { %v427_v13 = vrot.slane %v425_v8, 1 }
  0x48   : > { %600 = vmatpush.bf16.msrb.mxu1 %v3053_v10  ;;  %v428_v17 = vsel %vm384_vm15, %v423_v12, %v427_v13  ;;  %1224 = vmatpush.bf16.msra.mxu3 %v3089_v34  ;;  %v5631_v10 = vmov 0  ;;  %v3073_v13 = vld [vmem:[%s5560_s1 + $0x80] sm:$0xff] }
  0x49   : > { %1424 = vmatpush.bf16.msrb.mxu0 %v3094_v6  ;;  %v3137_v6 = vld [vmem:[%s5560_s1 + $0x230] sm:$0xff]  ;;  %510 = vmatmul.bf16.vlgmr.msra.gmra.mxu2 %v428_v17  ;;  %v3532_v17 = vunpack.c.l.b16 %v5569_v3 }
  0x4c   : > { %1425 = vmatmul.bf16.vlgmr.msrb.gmra.mxu0 %v1327_v14  ;;  %v3078_v14 = vld [vmem:[%s5560_s1 + $0xa8] sm:$0xff]  ;;  %601 = vmatpush.bf16.msrb.mxu1 %v3052_v18  ;;  %v3535_v18 = vunpack.c.h.b16 %v5569_v3 }
  0x4d   : > { %2445 = vmatpush.bf16.msra.mxu0 %v3138_v45  ;;  %931 = vmatpush.bf16.msrb.mxu2 %v3078_v14  ;;  %v3133_v45 = vld [vmem:[%s5560_s1 + $0x210] sm:$0xff]  ;;  %v3086_v14 = vld [vmem:[%s5560_s1 + $0xc0] sm:$0xff] }
  0x4e   : > { %1225 = vmatpush.bf16.msra.mxu3 %v3088_v41 }
  0x51   : > { %2446 = vmatpush.bf16.msra.mxu0 %v3137_v6  ;;  %932 = vmatpush.bf16.msrb.mxu2 %v3077_v21 }
  0x52   : > { %1226 = vmatpush.bf16.msra.mxu3 %v3087_v59 }
  0x55   : > { %2447 = vmatpush.bf16.msra.mxu0 %v3136_v16  ;;  %933 = vmatpush.bf16.msrb.mxu2 %v3076_v33 }
  0x56   : > { %1227 = vmatpush.bf16.msra.mxu3 %v3086_v14 }
  0x59   : > { %2448 = vmatpush.bf16.msra.mxu0 %v3135_v30  ;;  %934 = vmatpush.bf16.msrb.mxu2 %v3075_v40 }
  0x5c   : > { %1430 = vmatmul.bf16.gmra.mxu0 %v1336_v29 }
  0x5d   : > { %2449 = vmatpush.bf16.msra.mxu0 %v3134_v36  ;;  %935 = vmatpush.bf16.msrb.mxu2 %v3074_v58 }
  0x61   : > { %2450 = vmatpush.bf16.msra.mxu0 %v3133_v45  ;;  %936 = vmatpush.bf16.msrb.mxu2 %v3073_v13 }
  0x68   : > { %v257_v46 = vpop.permute.xlu2 %256 }
  0x69   : > { %vm283_vm6 = vcmp.eq.s32.totalorder %v257_v46, 1  ;;  %v233_v46 = vld [vmem:[%s3260_s12 + $0x4] sm:$0xf] }
  0x6a   : > { %vm3374_vm7 = vmpackc.low %vm283_vm6, %vm283_vm6  ;;  %vm699_vm6 = vcmask 1040384  }
  0x6b   : > { %v3381_v50 = vsel %vm3374_vm7, 65537, %v5569_v3  ;;  %v303_v60 = vsel %vm3374_vm7, %v233_v46, 0 }
  0x6c   : > { %v1749_v55 = vrot.slane %v3381_v50, 6  ;;  %1435 = vmatmul.bf16.gmra.mxu0 %v1345_v53  ;;  %v996_v47 = vrot.slane %v3381_v50, 7  ;;  %v527_v15 = vunpack.c.l.b16 %v303_v60 }
  0x6e   : > { %v1751_v61 = vrot.slane %v1749_v55, 4  ;;  %v998_v6 = vrot.slane %v996_v47, 4 }
  0x70   : > { %v260_v56 = vpop.permute.xlu2 %259 }
  0x71   : > { %vm284_vm10 = vcmp.eq.s32.totalorder %v260_v56, 1 }
  0x72   : > { %vm3395_vm11 = vmpackc.low %vm284_vm10, %vm284_vm10 }
  0x73   : > { %v3406_v0 = vsel %vm3395_vm11, 65537, %v5569_v3  ;;  %v304_v7 = vsel %vm3395_vm11, %v234_v54, 0  ;;  %vm3512_vm10 = vmor %vm699_vm6, %vm700_vm8 }
  0x74   : > { %v1752_v2 = vrot.slane %v3406_v0, 6  ;;  %v999_v8 = vrot.slane %v3406_v0, 7  ;;  %v5632_v10 = vsel %vm3512_vm10, 4294967295, %v5631_v10  ;;  %v240_v0 = vld [vmem:[%s3260_s12 + $0x20] sm:$0xf] }
  0x76   : > { %v3416_v9 = vsel %vm3399_vm12, %v1751_v61, %v1752_v2  ;;  %v3132_v61 = vld [vmem:[%s5560_s1 + $0x208] sm:$0xff]  ;;  %v3545_v22 = vsel %vm3512_vm10, %v998_v6, %v999_v8  ;;  %v3558_v27 = vrot.slane %v1752_v2, 4 }
  0x77   : > { %2451 = vmatpush.bf16.msra.mxu0 %v3132_v61 }
  0x78   : > { %v653_v29 = vpop.permute.xlu2 %652 }
  0x79   : > { %vm673_vm3 = vcmp.eq.s32.totalorder %v653_v29, 1 }
  0x7a   : > { %vm683_vm9 = vmpackc.low %vm673_vm3, %vm673_vm3 }
  0x7b   : > { %v3517_v11 = vsel %vm683_vm9, 65537, %v5569_v3 }
  0x7c   : > { %1440 = vmatmul.bf16.gmra.mxu0 %v1354_v19  ;;  %v3537_v19 = vunpack.c.l.b16 %v304_v7  ;;  %v5571_v23 = vrot.slane %v3517_v11, 7  ;;  %v5568_v28 = vrot.slane %v3517_v11, 6  ;;  %v5567_v30 = vrot.slane %v3517_v11, 5 }
  0x7e   : > { %v3602_v53 = vrot.slane %v5568_v28, 4  ;;  %v3606_v54 = vrot.slane %v5567_v30, 4  ;;  %v3122_v28 = vld [vmem:[%s5560_s1 + $0x1b8] sm:$0xff] }
  0x7f   : > { %1973 = vmatpush.bf16.msra.mxu2 %v3122_v28  ;;  %v5657_v28 = vrot.slane %v3517_v11, 6 }
  0x80   : > { %v647_v25 = vpop.permute.xlu1 %646  ;;  %v269_v42 = vpop.permute.xlu2 %268 }
  0x81   : > { %v641_v26 = vpop.permute.xlu0 %640  ;;  %vm671_vm15 = vcmp.eq.s32.totalorder %v647_v25, 1  ;;  %vm287_vm7 = vcmp.eq.s32.totalorder %v269_v42, 1 }
  0x82   : > { %vm669_vm13 = vcmp.eq.s32.totalorder %v641_v26, 1  ;;  %vm681_vm1 = vmpackc.low %vm671_vm15, %vm671_vm15  ;;  %v3554_v26 = vrot.slane %v999_v8, 4  ;;  %vm2216_vm15 = vcmask 1046532  }
  0x83   : > { %vm679_vm14 = vmpackc.low %vm669_vm13, %vm669_vm13  ;;  %v3473_v48 = vsel %vm681_vm1, 65537, %v5569_v3 }
  0x84   : > { %v3455_v38 = vsel %vm679_vm14, 65537, %v5569_v3  ;;  %v1470_v1 = vrot.slane %v3473_v48, 6  ;;  %vm3539_vm11 = vmpackc.low %vm287_vm7, %vm287_vm7  ;;  %vm2215_vm14 = vcmask 1042432   ;;  %v707_v40 = vrot.slane %v3473_v48, 7 }
  0x85   : > { %v3465_v44 = vrot.slane %v3455_v38, 6  ;;  %v3568_v31 = vsel %vm3539_vm11, 65537, %v5569_v3  ;;  %v307_v33 = vsel %vm3539_vm11, %v237_v24, 0  ;;  %v2223_v42 = vrot.slane %v3473_v48, 5 }
  0x86   : > { %v3589_v45 = vrot.slane %v3455_v38, 7  ;;  %v5572_v58 = vrot.slane %v3568_v31, 6  ;;  %v1472_v60 = vrot.slane %v1470_v1, 4  ;;  %v3623_v61 = vrot.slane %v3455_v38, 5 }
  0x87   : > { %v1466_v56 = vrot.slane %v3465_v44, 4  ;;  %v3627_v6 = vrot.slane %v707_v40, 4  ;;  %v3629_v7 = vrot.slane %v2223_v42, 4 }
  0x88   : > { %v254_v39 = vpop.permute.xlu1 %253  ;;  %v662_v12 = vpop.permute.xlu2 %661  ;;  %v732_v20 = vunpack.c.h.b16 %v3589_v45 }
  0x89   : > { %v644_v37 = vpop.permute.xlu0 %643  ;;  %vm282_vm2 = vcmp.eq.s32.totalorder %v254_v39, 1  ;;  %vm676_vm13 = vcmp.eq.s32.totalorder %v662_v12, 1  ;;  %v3583_v39 = vrot.slane %v5571_v23, 4  ;;  %v703_v12 = vrot.slane %v3589_v45, 4 }
  0x8a   : > { %vm670_vm0 = vcmp.eq.s32.totalorder %v644_v37, 1  ;;  %vm3479_vm5 = vmpackc.low %vm282_vm2, %vm282_vm2 }
  0x8b   : > { %vm680_vm4 = vmpackc.low %vm670_vm0, %vm670_vm0  ;;  %v302_v49 = vsel %vm3479_vm5, %v232_v52, 0  ;;  %v3552_v25 = vsel %vm3479_vm5, 65537, %v5569_v3  ;;  %v3131_v52 = vld [vmem:[%s5560_s1 + $0x200] sm:$0xff] }
  0x8c   : > { %1445 = vmatmul.bf16.gmra.mxu0 %v1363_v43  ;;  %v3476_v51 = vsel %vm680_vm4, 65537, %v5569_v3  ;;  %v526_v16 = vunpack.c.l.b16 %v302_v49  ;;  %v3562_v29 = vrot.slane %v3552_v25, 6  ;;  %vm3574_vm1 = vmpackc.low %vm676_vm13, %vm676_vm13  ;;  %v5566_v43 = vrot.slane %v3568_v31, 7 }
  0x8d   : > { %v1467_v57 = vrot.slane %v3476_v51, 6  ;;  %2452 = vmatpush.bf16.msra.mxu0 %v3131_v52  ;;  %vm3659_vm5 = vmor %vm2215_vm14, %vm2216_vm15  ;;  %vm3764_vm13 = vcmp.ne.s32.totalorder %v732_v20, %v3535_v18 }
  0x8e   : > { %5635 = vst [vmem:[#allocation3_spill] sm:$0xff] %v3562_v29  ;;  %v536_v32 = vpack.c.b16 %v527_v15, %v526_v16  ;;  %v1748_v35 = vrot.slane %v3562_v29, 4  ;;  %v3633_v8 = vrot.slane %v5566_v43, 4  ;;  %v3650_v15 = vrot.slane %v5572_v58, 4  ;;  %v235_v43 = vld [vmem:[%s3260_s12 + $0xc] sm:$0xf] }
  0x8f   : > { %v3502_v4 = vsel %vm3399_vm12, %v1466_v56, %v1467_v57  ;;  %v1469_v5 = vrot.slane %v1467_v57, 4  ;;  %v3608_v56 = vunpack.c.l.b16 %v307_v33  ;;  %v704_v57 = vrot.slane %v3476_v51, 7  ;;  %v331_v29 = vld [vmem:[%s3260_s12 + $0xc] sm:$0xf] }
  0x90   : > { %v263_v41 = vpop.permute.xlu1 %262  ;;  %602 = vmatmul.bf16.vlgmr.msrb.gmra.mxu1 %v536_v32  ;;  %v3595_v46 = vsel %vm3399_vm12, %v1748_v35, %v1749_v55  ;;  %v3615_v55 = vsel %vm3574_vm1, 65537, %v5569_v3  ;;  %v278_v13 = vpop.permute.xlu2 %277  ;;  %v731_v16 = vunpack.c.l.b16 %v3589_v45  ;;  %v2219_v32 = vrot.slane %v3623_v61, 4 }
  0x91   : > { %v3523_v62 = vsel %vm3399_vm12, %v1469_v5, %v1470_v1  ;;  %v650_v21 = vpop.permute.xlu0 %649  ;;  %5638 = vst [vmem:[#allocation4_spill] sm:$0xff] %v3595_v46  ;;  %vm285_vm3 = vcmp.eq.s32.totalorder %v263_v41, 1  ;;  %v2220_v5 = vrot.slane %v3476_v51, 5  ;;  %v5564_v48 = vrot.slane %v3615_v55, 7 }
  0x92   : > { %vm672_vm0 = vcmp.eq.s32.totalorder %v650_v21, 1  ;;  %5639 = vst [vmem:[#allocation5_spill] sm:$0xff] %v3615_v55  ;;  %v5565_v1 = vrot.slane %v3615_v55, 5  ;;  %v706_v38 = vrot.slane %v704_v57, 4  ;;  %vm3644_vm4 = vmpackc.low %vm285_vm3, %vm285_vm3  ;;  %v5642_v33 = vmov 0 }
  0x93   : > { %vm682_vm2 = vmpackc.low %vm672_vm0, %vm672_vm0  ;;  %v5643_v33 = vsel %vm3659_vm5, 4294967295, %v5642_v33  ;;  %v3665_v34 = vsel %vm3512_vm10, %v703_v12, %v704_v57  ;;  %v2222_v35 = vrot.slane %v2220_v5, 4  ;;  %vm290_vm6 = vcmp.eq.s32.totalorder %v278_v13, 1 }
  0x94   : > { %v3618_v59 = vsel %vm682_vm2, 65537, %v5569_v3  ;;  %v3672_v52 = vsel %vm3644_vm4, 65537, %v5569_v3  ;;  %v3676_v37 = vrot.slane %v5564_v48, 4  ;;  %v3681_v57 = vrot.slane %v5565_v1, 4  ;;  %vm3701_vm8 = vmpackc.low %vm290_vm6, %vm290_vm6 }
  0x95   : > { %v1473_v49 = vrot.slane %v3618_v59, 6  ;;  %v3685_v12 = vsel %vm3512_vm10, %v706_v38, %v707_v40  ;;  %v3692_v48 = vsel %vm3659_vm5, %v2219_v32, %v2220_v5  ;;  %v3696_v36 = vsel %vm3659_vm5, %v2222_v35, %v2223_v42 }
  0x96   : > { %v3699_v1 = vrot.slane %v3552_v25, 7  ;;  %v1755_v38 = vrot.slane %v3672_v52, 6  ;;  %v3726_v32 = vsel %vm3701_vm8, 65537, %v5569_v3  ;;  %v710_v42 = vrot.slane %v3618_v59, 7 }
  0x97   : > { %v3642_v51 = vsel %vm3399_vm12, %v1472_v60, %v1473_v49  ;;  %v2226_v30 = vrot.slane %v3618_v59, 5  ;;  %v310_v23 = vsel %vm3701_vm8, %v240_v0, 0  ;;  %v5573_v58 = vrot.slane %v3726_v32, 6 }
  0x98   : > { %v656_v21 = vpop.permute.xlu1 %655  ;;  %v3720_v2 = vsel %vm3399_vm12, %v3558_v27, %v1755_v38  ;;  %v995_v27 = vrot.slane %v3699_v1, 4  ;;  %v1757_v24 = vrot.slane %v1755_v38, 4  ;;  %v1023_v13 = vunpack.c.l.b16 %v3699_v1 }
  0x99   : > { %v266_v60 = vpop.permute.xlu0 %265  ;;  %5648 = vst [vmem:[#allocation6_spill] sm:$0xff] %v3720_v2  ;;  %v1024_v45 = vunpack.c.h.b16 %v3699_v1  ;;  %v712_v1 = vrot.slane %v710_v42, 4  ;;  %v1475_v41 = vrot.slane %v1473_v49, 4  ;;  %vm3759_vm11 = vcmp.ne.s32.totalorder %v731_v16, %v3532_v17  ;;  %v973_v2 = vld [vmem:[%s3260_s12 + $0x4] sm:$0xe] }
  0x9a   : > { %vm286_vm9 = vcmp.eq.s32.totalorder %v266_v60, 1  ;;  %v3772_v0 = vsel %vm3512_vm10, %v995_v27, %v996_v47  ;;  %v3778_v49 = vsel %vm3512_vm10, %v3627_v6, %v710_v42  ;;  %v5653_v16 = vrot.slane %v3568_v31, 6 }
  0x9b   : > { %vm3710_vm7 = vmpackc.low %vm286_vm9, %vm286_vm9  ;;  %v2228_v40 = vrot.slane %v2226_v30, 4  ;;  %v5655_v27 = vrot.slane %v3726_v32, 7  ;;  %v1002_v6 = vrot.slane %v3672_v52, 7  ;;  %vm674_vm14 = vcmp.eq.s32.totalorder %v656_v21, 1  ;;  %v236_v52 = vld [vmem:[%s3260_s12 + $0x10] sm:$0xf] }
  0x9c   : > { %v3733_v35 = vsel %vm3710_vm7, 65537, %v5569_v3  ;;  %v305_v3 = vsel %vm3644_vm4, %v235_v43, 0  ;;  %v2227_v50 = vsel %vm3659_vm5, %v3629_v7, %v2226_v30  ;;  %vm3832_vm15 = vmpackc.low %vm674_vm14, %vm674_vm14  ;;  %vm3862_vm3 = vcmp.ne.s32.totalorder %v1023_v13, %v3532_v17 }
  0x9d   : > { %v1758_v5 = vrot.slane %v3733_v35, 6  ;;  %v529_v47 = vunpack.c.l.b16 %v305_v3  ;;  %v3792_v59 = vrot.slane %v5655_v27, 4  ;;  %v3810_v27 = vsel %vm3399_vm12, %v1475_v41, %v5657_v28 }
  0x9e   : > { %5658 = vst [vmem:[#allocation8_spill] sm:$0xff] %v3810_v27  ;;  %v5659_v28 = vrot.slane %v3517_v11, 5  ;;  %vm3867_vm4 = vcmp.ne.s32.totalorder %v1024_v45, %v3535_v18  ;;  %v2268_v41 = vunpack.c.l.b16 %v2227_v50  ;;  %v5682_v46 = vmov 0 }
  0x9f   : > { %v3748_v60 = vsel %vm3399_vm12, %v1757_v24, %v1758_v5  ;;  %v1760_v38 = vrot.slane %v1758_v5, 4  ;;  %v3788_v5 = vunpack.c.l.b16 %v310_v23  ;;  %v1005_v24 = vrot.slane %v3733_v35, 7 }
  0xa0   : > { %v272_v42 = vpop.permute.xlu1 %271  ;;  %v537_v7 = vpack.c.b16 %v529_v47, %v3537_v19  ;;  %v5662_v35 = vunpack.c.l.b16 %v3623_v61  ;;  %v3857_v47 = vsel %vm3512_vm10, %v3554_v26, %v1002_v6  ;;  %v1004_v26 = vrot.slane %v1002_v6, 4 }
  0xa1   : > { %v3784_v20 = vsel %vm3399_vm12, %v1760_v38, %v5653_v16  ;;  %5654 = vst [vmem:[#allocation7_spill] sm:$0xff] %v3788_v5  ;;  %v3797_v38 = vrot.slane %v5573_v58, 4  ;;  %v5656_v16 = vrot.slane %v3517_v11, 7  ;;  %v3829_v58 = vsel %vm3659_vm5, %v2228_v40, %v5659_v28 }
  0xa2   : > { %vm288_vm0 = vcmp.eq.s32.totalorder %v272_v42, 1  ;;  %vm3840_vm1 = vcmp.ne.s32.totalorder %v5662_v35, %v3532_v17  ;;  %v5665_v11 = vunpack.c.h.b16 %v3623_v61  ;;  %v3859_v35 = vpop.permute.xlu0 %658  ;;  %v2269_v28 = vunpack.c.h.b16 %v2227_v50  ;;  %607 = vmatmul.bf16.gmra.mxu1 %v537_v7  ;;  %v3129_v42 = vld [vmem:[%s5560_s1 + $0x1f0] sm:$0xff]  ;;  %v628_v7 = vld [vmem:[%s3260_s12] sm:$0xe] }
  0xa3   : > { %v3803_v3 = vsel %vm3512_vm10, %v712_v1, %v5656_v16  ;;  %v3130_v1 = vld [vmem:[%s5560_s1 + $0x1f8] sm:$0xff]  ;;  %v1007_v13 = vrot.slane %v1005_v24, 4  ;;  %vm3882_vm6 = vmpackc.low %vm288_vm0, %vm288_vm0  ;;  %v5673_v19 = vmov 0  ;;  %v3890_v25 = vsel %vm3512_vm10, %v1004_v26, %v1005_v24 }
  0xa4   : > { %v3109_v16 = vld [vmem:[%s5560_s1 + $0x178] sm:$0xff]  ;;  %vm3847_vm2 = vcmp.ne.s32.totalorder %v5665_v11, %v3535_v18  ;;  %2170 = vmatpush.bf16.msrb.mxu3 %v3130_v1  ;;  %v306_v1 = vsel %vm3710_vm7, %v236_v52, 0  ;;  %v5674_v19 = vsel %vm3882_vm6, 4294967295, %v5673_v19  ;;  %v3121_v52 = vld [vmem:[%s5560_s1 + $0x1b0] sm:$0xff]  ;;  %v5675_v24 = vunpack.c.l.b16 %v3665_v34 }
  0xa5   : > { %1692 = vmatpush.bf16.msra.mxu1 %v3109_v16  ;;  %v5672_v16 = vmov 0   ;;  %v3909_v23 = vunpack.c.l.b16 %v306_v1  ;;  %1974 = vmatpush.bf16.msra.mxu2 %v3121_v52  ;;  %v5681_v50 = vunpack.c.l.b16 %v3692_v48  ;;  %v5684_v27 = vunpack.c.h.b16 %v3692_v48  ;;  %v4036_v1 = vld [vmem:[%s3260_s12 + $0xc] sm:$0xf] }
  0xa6   : > { %v3878_v45 = vsel %vm3832_vm15, 65537, %v5672_v16  ;;  %vm3905_vm9 = vcmp.ne.s32.totalorder %v5675_v24, %v3532_v17  ;;  %v3915_v30 = vsel %vm3882_vm6, 65537, %v5672_v16  ;;  %v5678_v24 = vunpack.c.h.b16 %v3665_v34 }
  0xa7   : > { %v716_v6 = vrot.slane %v3878_v45, 7  ;;  %vm3932_vm15 = vcmp.ne.s32.totalorder %v5681_v50, %v3532_v17  ;;  %vm3939_vm0 = vcmp.ne.s32.totalorder %v5684_v27, %v3535_v18  ;;  %v5685_v5 = vmov 0 }
  0xa8   : > { %vm3925_vm14 = vcmp.ne.s32.totalorder %v5678_v24, %v3535_v18  ;;  %2171 = vmatpush.bf16.msrb.mxu3 %v3129_v42  ;;  %v5683_v46 = vsel %vm3932_vm15, 4294967295, %v5682_v46  ;;  %v5686_v5 = vsel %vm3939_vm0, 4294967295, %v5685_v5  ;;  %v5687_v34 = vrot.slane %v3568_v31, 7  ;;  %vm5702_vm15 = vmpackc.low %vm3764_vm13, %vm3759_vm11 }
  0xa9   : > { %vm3953_vm8 = vcmp.ne.s32.totalorder %v2268_v41, %v3532_v17  ;;  %v5688_v48 = vmov 0  ;;  %vm3958_vm7 = vcmp.ne.s32.totalorder %v2269_v28, %v3535_v18  ;;  %v5690_v27 = vmov 0  ;;  %vm5705_vm11 = vmpackc.low %vm3925_vm14, %vm3905_vm9 }
  0xaa   : > { %v3947_v52 = vsel %vm3512_vm10, %v1007_v13, %v5687_v34  ;;  %v5689_v48 = vsel %vm3953_vm8, 4294967295, %v5688_v48  ;;  %v5691_v27 = vsel %vm3958_vm7, 4294967295, %v5690_v27  ;;  %v329_v13 = vld [vmem:[%s3260_s12 + $0x4] sm:$0xf]  ;;  %v330_v34 = vld [vmem:[%s3260_s12 + $0x8] sm:$0xf]  ;;  %v5692_v41 = vunpack.c.l.b16 %v3685_v12  ;;  %v275_v11 = vpop.permute.xlu0 %274 }
  0xab   : > { %v5695_v28 = vunpack.c.h.b16 %v3685_v12  ;;  %v5698_v24 = vunpack.c.l.b16 %v3778_v49  ;;  %v5701_v12 = vunpack.c.h.b16 %v3778_v49  ;;  %v4009_v50 = vsel %vm3512_vm10, %v3583_v39, %v716_v6  ;;  %vm5717_vm10 = vmpackc.low %vm3867_vm4, %vm3862_vm3 }
  0xac   : > { %vm3972_vm5 = vcmp.ne.s32.totalorder %v5692_v41, %v3532_v17  ;;  %v4011_v42 = vrot.slane %v716_v6, 4  ;;  %v5703_v49 = vrot.slane %v3915_v30, 6  ;;  %v809_v39 = vsel %vm5705_vm11, %v329_v13, 0 }
  0xad   : > { %vm3979_vm7 = vcmp.ne.s32.totalorder %v5695_v28, %v3535_v18  ;;  %vm3986_vm8 = vcmp.ne.s32.totalorder %v5698_v24, %v3532_v17  ;;  %vm757_vm0 = vcmp.ne.s32.totalorder %v5701_v12, %v3535_v18  ;;  %v808_v24 = vsel %vm5702_vm15, %v628_v7, 0 }
  0xae   : > { %vm751_vm6 = vmpackc.low %vm3979_vm7, %vm3972_vm5  ;;  %v4018_v14 = vsel %vm3399_vm12, %v3650_v15, %v5703_v49  ;;  %v847_v12 = vunpack.c.l.b16 %v808_v24  ;;  %v848_v49 = vunpack.c.l.b16 %v809_v39  ;;  %v1030_v26 = vunpack.c.l.b16 %v3772_v0 }
  0xaf   : > { %5704 = vst [vmem:[#allocation9_spill] sm:$0xff] %v4018_v14  ;;  %vm758_vm5 = vmpackc.low %vm757_vm0, %vm3986_vm8  ;;  %v810_v6 = vsel %vm751_vm6, %v330_v34, 0  ;;  %v1031_v13 = vunpack.c.h.b16 %v3772_v0  ;;  %vm5706_vm8 = vcmp.eq.s32.totalorder %v3859_v35, 1  ;;  %v5709_v24 = vunpack.c.l.b16 %v3545_v22 }
  0xb0   : > { %v811_v31 = vsel %vm758_vm5, %v331_v29, 0  ;;  %v849_v41 = vunpack.c.l.b16 %v810_v6  ;;  %vm4047_vm9 = vmpackc.low %vm5706_vm8, %vm5706_vm8  ;;  %v858_v34 = vpack.c.b16 %v848_v49, %v847_v12  ;;  %v5710_v39 = vunpack.c.h.b16 %v3545_v22  ;;  %v4134_v49 = vld [vmem:[%s3260_s12 + $0xc] sm:$0xf] }
  0xb1   : > { %v850_v7 = vunpack.c.l.b16 %v811_v31  ;;  %vm1041_vm7 = vcmp.ne.s32.totalorder %v5709_v24, %v3532_v17  ;;  %v5711_v6 = vunpack.c.l.b16 %v3857_v47  ;;  %v4067_v31 = vld [vmem:[%s3260_s12 + $0x10] sm:$0xf]  ;;  %vm1034_vm0 = vcmp.ne.s32.totalorder %v1030_v26, %v3532_v17 }
  0xb2   : > { %vm1042_vm14 = vcmp.ne.s32.totalorder %v5710_v39, %v3535_v18  ;;  %vm1035_vm5 = vcmp.ne.s32.totalorder %v1031_v13, %v3535_v18  ;;  %v5714_v22 = vunpack.c.h.b16 %v3857_v47  ;;  %vm5597_vm13 = vcmask 1046528  }
  0xb3   : > { %vm4060_vm15 = vcmp.ne.s32.totalorder %v5711_v6, %v3532_v17  ;;  %v4064_v35 = vpack.c.b16 %v850_v7, %v849_v41  ;;  %vm1043_vm11 = vmpackc.low %vm1042_vm14, %vm1041_vm7  ;;  %v4080_v41 = vld [vmem:[%s3260_s12 + $0x8] sm:$0xf]  ;;  %v1100_v7 = vsel %vm5717_vm10, %v973_v2, 0  ;;  %v865_v13 = vrot.slane %v858_v34, 1  ;;  %v3108_v2 = vld [vmem:[%s5560_s1 + $0x170] sm:$0xff] }
  0xb4   : > { %vm4074_vm8 = vcmp.ne.s32.totalorder %v5714_v22, %v3535_v18  ;;  %vm1036_vm6 = vmpackc.low %vm1035_vm5, %vm1034_vm0  ;;  %v1102_v26 = vsel %vm1043_vm11, %v4036_v1, 0  ;;  %v4101_v61 = vsel %vm4047_vm9, 65537, %v5672_v16  ;;  %v1139_v6 = vunpack.c.l.b16 %v1100_v7  ;;  %v2214_v22 = vld [vmem:[%s3260_s12 + $0x8] sm:$0x8]  ;;  %1693 = vmatpush.bf16.msra.mxu1 %v3108_v2  ;;  %v665_v2 = vpop.permute.xlu1 %664 }
  0xb5   : > { %v5591_v24 = vrot.slane %v4064_v35, 1  ;;  %vm1050_vm7 = vmpackc.low %vm4074_vm8, %vm4060_vm15  ;;  %v1101_v39 = vsel %vm1036_vm6, %v4080_v41, 0  ;;  %vm5718_vm10 = vnez %v5683_v46  ;;  %vm5719_vm3 = vnez %v5686_v5 }
  0xb6   : > { %v1103_v34 = vsel %vm1050_vm7, %v4067_v31, 0  ;;  %v1140_v0 = vunpack.c.l.b16 %v1101_v39  ;;  %vm2260_vm4 = vmpackc.low %vm5719_vm3, %vm5718_vm10  ;;  %v5720_v12 = vunpack.c.l.b16 %v3502_v4  ;;  %v5723_v29 = vunpack.c.h.b16 %v3502_v4  ;;  %v4137_v4 = vld [vmem:[%s3260_s12 + $0x14] sm:$0xf] }
  0xb7   : > { %v5726_v7 = vrot.slane %v3878_v45, 6  ;;  %v1141_v28 = vunpack.c.l.b16 %v1102_v26  ;;  %v1142_v47 = vunpack.c.l.b16 %v1103_v34  ;;  %vm5727_vm14 = vnez %v5689_v48  ;;  %vm5732_vm8 = vmpackc.low %vm3847_vm2, %vm3840_vm1  ;;  %v3126_v48 = vld [vmem:[%s5560_s1 + $0x1d8] sm:$0xff] }
  0xb8   : > { %vm4112_vm6 = vcmp.ne.s32.totalorder %v5720_v12, %v3532_v17  ;;  %vm4119_vm9 = vcmp.ne.s32.totalorder %v5723_v29, %v3535_v18  ;;  %v867_v12 = vsel %vm5597_vm13, %v865_v13, %v5591_v24  ;;  %vm5728_vm15 = vnez %v5691_v27 }
  0xb9   : > { %v4128_v39 = vsel %vm3399_vm12, %v3602_v53, %v5726_v7  ;;  %vm2274_vm0 = vmpackc.low %vm5728_vm15, %vm5727_vm14  ;;  %v5729_v53 = vmov %v5726_v7  ;;  %v2232_v7 = vrot.slane %v3878_v45, 5  ;;  %937 = vmatmul.bf16.vlgmr.msrb.gmra.mxu2 %v867_v12  ;;  %v1150_v26 = vpack.c.b16 %v1140_v0, %v1139_v6  ;;  %v4163_v0 = vld [vmem:[%s3260_s12 + $0x10] sm:$0xf] }
  0xba   : > { %v4145_v29 = vrot.slane %v5729_v53, 4  ;;  %v5730_v13 = vunpack.c.l.b16 %v3696_v36  ;;  %v719_v34 = vrot.slane %v4101_v61, 7  ;;  %v4152_v24 = vpack.c.b16 %v1142_v47, %v1141_v28 }
  0xbb   : > { %v5731_v14 = vunpack.c.h.b16 %v3696_v36  ;;  %v2324_v45 = vsel %vm5732_vm8, %v2214_v22, 0  ;;  %v1156_v6 = vrot.slane %v1150_v26, 1  ;;  %v2325_v28 = vsel %vm2260_vm4, %v4134_v49, 0 }
  0xbc   : > { %vm2265_vm5 = vcmp.ne.s32.totalorder %v5730_v13, %v3532_v17  ;;  %v2327_v36 = vsel %vm2274_vm0, %v4137_v4, 0  ;;  %v2363_v21 = vunpack.c.l.b16 %v2324_v45  ;;  %v5593_v40 = vrot.slane %v4152_v24, 1 }
  0xbd   : > { %vm2266_vm11 = vcmp.ne.s32.totalorder %v5731_v14, %v3535_v18  ;;  %v2364_v47 = vunpack.c.l.b16 %v2325_v28  ;;  %v2366_v22 = vunpack.c.l.b16 %v2327_v36  ;;  %v5733_v5 = vunpack.c.l.b16 %v3642_v51 }
  0xbe   : > { %vm2267_vm7 = vmpackc.low %vm2266_vm11, %vm2265_vm5  ;;  %v5736_v27 = vunpack.c.h.b16 %v3642_v51  ;;  %v1482_v53 = vrot.slane %v4101_v61, 6  ;;  %vm289_vm10 = vcmp.eq.s32.totalorder %v275_v11, 1  ;;  %v2235_v45 = vrot.slane %v4101_v61, 5 }
  0xbf   : > { %v2326_v14 = vsel %vm2267_vm7, %v4163_v0, 0  ;;  %vm4182_vm1 = vcmp.ne.s32.totalorder %v5733_v5, %v3532_v17  ;;  %v1158_v28 = vsel %vm5597_vm13, %v1156_v6, %v5593_v40  ;;  %v2374_v36 = vpack.c.b16 %v2364_v47, %v2363_v21  ;;  %vm4200_vm3 = vmpackc.low %vm289_vm10, %vm289_vm10 }
  0xc0   : > { %vm4189_vm2 = vcmp.ne.s32.totalorder %v5736_v27, %v3535_v18  ;;  %v2365_v26 = vunpack.c.l.b16 %v2326_v14  ;;  %vm5741_vm4 = vnez %v5643_v33  ;;  %1228 = vmatmul.bf16.vlgmr.msra.gmra.mxu3 %v1158_v28  ;;  %v4214_v61 = vsel %vm4200_vm3, 65537, %v5672_v16  ;;  %v668_v27 = vpop.permute.xlu0 %667  ;;  %vm1507_vm5 = vmpackc.low %vm4119_vm9, %vm4112_vm6 }
  0xc1   : > { %v4207_v5 = vsel %vm5741_vm4, %v3606_v54, %v2232_v7  ;;  %v538_v6 = vpack.c.b16 %v3608_v56, %v3909_v23  ;;  %v721_v21 = vrot.slane %v719_v34, 4  ;;  %v5742_v14 = vrot.slane %v3915_v30, 6  ;;  %vm1521_vm13 = vmpackc.low %vm4189_vm2, %vm4182_vm1 }
  0xc2   : > { %v4209_v11 = vpack.c.b16 %v2366_v22, %v2365_v26  ;;  %vm5596_vm14 = vcmask 1044480   ;;  %v1767_v54 = vrot.slane %v4214_v61, 6  ;;  %v2234_v28 = vrot.slane %v2232_v7, 4  ;;  %v238_v7 = vld [vmem:[%s3260_s12 + $0x18] sm:$0xf] }
  0xc3   : > { %v1766_v47 = vrot.slane %v5742_v14, 4  ;;  %v1484_v22 = vrot.slane %v1482_v53, 4  ;;  %v2381_v26 = vrot.slane %v2374_v36, 3  ;;  %612 = vmatmul.bf16.gmra.mxu1 %v538_v6  ;;  %vm5743_vm15 = vnez %v5632_v10 }
  0xc4   : > { %v5595_v13 = vrot.slane %v4209_v11, 3  ;;  %v4225_v12 = vsel %vm5743_vm15, %v4011_v42, %v719_v34  ;;  %v1769_v23 = vrot.slane %v1767_v54, 4  ;;  %vm677_vm0 = vcmp.eq.s32.totalorder %v665_v2, 1 }
  0xc5   : > { %v4229_v56 = vsel %vm3399_vm12, %v1766_v47, %v1767_v54  ;;  %v2237_v40 = vrot.slane %v2235_v45, 4  ;;  %vm678_vm11 = vcmp.eq.s32.totalorder %v668_v27, 1  ;;  %v5745_v36 = vrot.slane %v3615_v55, 7  ;;  %vm4278_vm8 = vmpackc.low %vm677_vm0, %vm677_vm0 }
  0xc6   : > { %5744 = vst [vmem:[#allocation10_spill] sm:$0xff] %v4229_v56  ;;  %v2383_v42 = vsel %vm5596_vm14, %v2381_v26, %v5595_v13  ;;  %v1011_v47 = vrot.slane %v3915_v30, 7  ;;  %v5746_v54 = vrot.slane %v3726_v32, 6  ;;  %v281_v56 = vpop.permute.xlu1 %280  ;;  %v3120_v26 = vld [vmem:[%s5560_s1 + $0x1a8] sm:$0xff]  ;;  %vm4303_vm0 = vmpackc.low %vm678_vm11, %vm678_vm11  ;;  %vm5760_vm14 = vnez %v5674_v19 }
  0xc7   : > { %v4245_v6 = vsel %vm5743_vm15, %v721_v21, %v5745_v36  ;;  %2453 = vmatmul.bf16.vlgmr.msra.gmra.mxu0 %v2383_v42  ;;  %v3128_v13 = vld [vmem:[%s5560_s1 + $0x1e8] sm:$0xff]  ;;  %v773_v21 = vunpack.c.l.b16 %v4225_v12  ;;  %v5748_v36 = vrot.slane %v3615_v55, 6  ;;  %v4284_v42 = vsel %vm5741_vm4, %v2234_v28, %v2235_v45  ;;  %1975 = vmatpush.bf16.msra.mxu2 %v3120_v26  ;;  %v3119_v28 = vld [vmem:[%s5560_s1 + $0x1a0] sm:$0xff] }
  0xc8   : > { %v4252_v14 = vsel %vm3399_vm12, %v1769_v23, %v5746_v54  ;;  %v3107_v30 = vld [vmem:[%s5560_s1 + $0x168] sm:$0xff]  ;;  %v4268_v23 = vsel %vm3399_vm12, %v4145_v29, %v1482_v53  ;;  %v5751_v29 = vunpack.c.l.b16 %v3523_v62  ;;  %2172 = vmatpush.bf16.msrb.mxu3 %v3128_v13  ;;  %vm291_vm11 = vcmp.eq.s32.totalorder %v281_v56, 1  ;;  %v3118_v53 = vld [vmem:[%s5560_s1 + $0x198] sm:$0xff] }
  0xc9   : > { %5747 = vst [vmem:[#allocation11_spill] sm:$0xff] %v4252_v14  ;;  %v4274_v54 = vsel %vm3399_vm12, %v1484_v22, %v5748_v36  ;;  %v5754_v22 = vunpack.c.h.b16 %v3523_v62  ;;  %v1014_v36 = vrot.slane %v4214_v61, 7  ;;  %v308_v61 = vsel %vm5760_vm14, %v238_v7, 0  ;;  %1694 = vmatpush.bf16.msra.mxu1 %v3107_v30  ;;  %v336_v14 = vld [vmem:[%s3260_s12 + $0x20] sm:$0xf] }
  0xca   : > { %vm4289_vm7 = vcmp.ne.s32.totalorder %v5751_v29, %v3532_v17  ;;  %v5759_v29 = vrot.slane %v3615_v55, 5  ;;  %v4324_v26 = vsel %vm5743_vm15, %v3633_v8, %v1011_v47  ;;  %v4333_v19 = vsel %vm4278_vm8, 65537, %v5672_v16  ;;  %vm4360_vm8 = vmpackc.low %vm291_vm11, %vm291_vm11 }
  0xcb   : > { %vm4296_vm10 = vcmp.ne.s32.totalorder %v5754_v22, %v3535_v18  ;;  %5761 = vst [vmem:[#allocation12_spill] sm:$0xff] %v4333_v19  ;;  %v4347_v8 = vsel %vm1507_vm5, %v4080_v41, 0  ;;  %v4352_v34 = vsel %vm4303_vm0, 65537, %v5672_v16  ;;  %v4356_v13 = vunpack.c.l.b16 %v308_v61  ;;  %1976 = vmatpush.bf16.msra.mxu2 %v3119_v28 }
  0xcc   : > { %v4315_v22 = vsel %vm5741_vm4, %v2237_v40, %v5759_v29  ;;  %vm1514_vm14 = vmpackc.low %vm4296_vm10, %vm4289_vm7  ;;  %5762 = vst [vmem:[#allocation13_spill] sm:$0xff] %v4352_v34  ;;  %v1016_v7 = vrot.slane %v1014_v36, 4  ;;  %v1013_v15 = vrot.slane %v1011_v47, 4  ;;  %v239_v40 = vld [vmem:[%s3260_s12 + $0x1c] sm:$0xf]  ;;  %v725_v30 = vrot.slane %v4333_v19, 7 }
  0xcd   : > { %v4374_v56 = vsel %vm1521_vm13, %v4067_v31, 0  ;;  %v2241_v28 = vrot.slane %v4333_v19, 5  ;;  %v728_v47 = vrot.slane %v4352_v34, 7  ;;  %v4385_v29 = vsel %vm1514_vm14, %v4036_v1, 0 }
  0xce   : > { %v4390_v31 = vsel %vm4360_vm8, 65537, %v5672_v16  ;;  %v5765_v46 = vunpack.c.l.b16 %v3803_v3  ;;  %v5768_v2 = vunpack.c.h.b16 %v3803_v3  ;;  %v309_v1 = vsel %vm4200_vm3, %v239_v40, 0 }
  0xcf   : > { %v4410_v16 = vsel %vm5743_vm15, %v1013_v15, %v1014_v36  ;;  %v5771_v61 = vrot.slane %v3726_v32, 7  ;;  %v5598_v3 = vrot.slane %v4390_v31, 6  ;;  %v727_v51 = vrot.slane %v725_v30, 4  ;;  %v333_v15 = vld [vmem:[%s3260_s12 + $0x14] sm:$0xf]  ;;  %1977 = vmatpush.bf16.msra.mxu2 %v3118_v53  ;;  %v3105_v36 = vld [vmem:[%s5560_s1 + $0x158] sm:$0xff] }
  0xd0   : > { %vm4395_vm13 = vcmp.ne.s32.totalorder %v5765_v46, %v3532_v17  ;;  %vm4402_vm6 = vcmp.ne.s32.totalorder %v5768_v2, %v3535_v18  ;;  %v4422_v2 = vsel %vm5743_vm15, %v3676_v37, %v725_v30  ;;  %v5772_v40 = vunpack.c.l.b16 %v4009_v50 }
  0xd1   : > { %v4416_v46 = vsel %vm5743_vm15, %v1016_v7, %v5771_v61  ;;  %v5775_v32 = vunpack.c.h.b16 %v4009_v50  ;;  %v4443_v30 = vsel %vm5741_vm4, %v3681_v57, %v2241_v28  ;;  %v4445_v61 = vrot.slane %v728_v47, 4  ;;  %vm765_vm2 = vmpackc.low %vm4402_vm6, %vm4395_vm13  ;;  %v4461_v57 = vld [vmem:[%s3260_s12 + $0x24] sm:$0xf] }
  0xd2   : > { %vm4427_vm9 = vcmp.ne.s32.totalorder %v5772_v40, %v3532_v17  ;;  %v332_v40 = vld [vmem:[%s3260_s12 + $0x10] sm:$0xf]  ;;  %v4452_v50 = vunpack.c.l.b16 %v309_v1  ;;  %v4458_v37 = vsel %vm5743_vm15, %v727_v51, %v728_v47  ;;  %v4471_v1 = vsel %vm3399_vm12, %v3797_v38, %v5598_v3  ;;  %v3127_v47 = vld [vmem:[%s5560_s1 + $0x1e0] sm:$0xff] }
  0xd3   : > { %vm4434_vm1 = vcmp.ne.s32.totalorder %v5775_v32, %v3535_v18  ;;  %v4482_v41 = vrot.slane %v2241_v28, 4  ;;  %v812_v38 = vsel %vm765_vm2, %v332_v40, 0  ;;  %2173 = vmatpush.bf16.msrb.mxu3 %v3127_v47  ;;  %v3106_v28 = vld [vmem:[%s5560_s1 + $0x160] sm:$0xff]  ;;  %v5778_v40 = vunpack.c.l.b16 %v3890_v25 }
  0xd4   : > { %vm772_vm3 = vmpackc.low %vm4434_vm1, %vm4427_vm9  ;;  %v851_v51 = vunpack.c.l.b16 %v812_v38  ;;  %1695 = vmatpush.bf16.msra.mxu1 %v3106_v28  ;;  %v5781_v7 = vunpack.c.h.b16 %v3890_v25  ;;  %v5785_v38 = vunpack.c.h.b16 %v3947_v52  ;;  %v5788_v53 = vunpack.c.l.b16 %v3829_v58 }
  0xd5   : > { %v813_v62 = vsel %vm772_vm3, %v333_v15, 0  ;;  %vm4517_vm5 = vcmp.ne.s32.totalorder %v5778_v40, %v3532_v17  ;;  %v5797_v27 = vunpack.c.h.b16 %v4207_v5  ;;  %vm4595_vm2 = vcmp.ne.s32.totalorder %v773_v21, %v3532_v17 }
  0xd6   : > { %v852_v32 = vunpack.c.l.b16 %v813_v62  ;;  %vm1056_vm7 = vcmp.ne.s32.totalorder %v5781_v7, %v3535_v18  ;;  %v5782_v62 = vunpack.c.l.b16 %v3947_v52  ;;  %vm4537_vm0 = vcmp.ne.s32.totalorder %v5785_v38, %v3535_v18  ;;  %v4551_v7 = vld [vmem:[%s3260_s12 + $0x14] sm:$0xf]  ;;  %v335_v38 = vld [vmem:[%s3260_s12 + $0x1c] sm:$0xf] }
  0xd7   : > { %vm4544_vm11 = vcmp.ne.s32.totalorder %v5788_v53, %v3532_v17  ;;  %vm1057_vm14 = vmpackc.low %vm1056_vm7, %vm4517_vm5  ;;  %v5791_v52 = vunpack.c.h.b16 %v3829_v58  ;;  %v5794_v53 = vunpack.c.l.b16 %v4207_v5  ;;  %vm4575_vm9 = vcmp.ne.s32.totalorder %v5797_v27, %v3535_v18  ;;  %2174 = vmatpush.bf16.msrb.mxu3 %v3126_v48  ;;  %v4580_v58 = vld [vmem:[%s3260_s12 + $0x18] sm:$0xf] }
  0xd8   : > { %vm4530_vm10 = vcmp.ne.s32.totalorder %v5782_v62, %v3532_v17  ;;  %v4548_v40 = vpack.c.b16 %v852_v32, %v851_v51  ;;  %v4556_v62 = vld [vmem:[%s3260_s12 + $0x18] sm:$0xf]  ;;  %v539_v5 = vpack.c.b16 %v4452_v50, %v4356_v13  ;;  %v5802_v15 = vunpack.c.h.b16 %v4225_v12  ;;  %1696 = vmatpush.bf16.msra.mxu1 %v3105_v36 }
  0xd9   : > { %vm4561_vm13 = vcmp.ne.s32.totalorder %v5791_v52, %v3535_v18  ;;  %vm4568_vm6 = vcmp.ne.s32.totalorder %v5794_v53, %v3532_v17  ;;  %vm1064_vm1 = vmpackc.low %vm4537_vm0, %vm4530_vm10  ;;  %v1104_v52 = vsel %vm1057_vm14, %v4551_v7, 0  ;;  %v4588_v53 = vld [vmem:[%s3260_s12 + $0x1c] sm:$0xf]  ;;  %v5805_v27 = vunpack.c.l.b16 %v3465_v44 }
  0xda   : > { %vm4602_vm3 = vcmp.ne.s32.totalorder %v5802_v15, %v3535_v18  ;;  %v5808_v21 = vunpack.c.h.b16 %v3465_v44  ;;  %v5601_v12 = vrot.slane %v4548_v40, 1  ;;  %v1105_v15 = vsel %vm1064_vm1, %v4580_v58, 0  ;;  %vm2281_vm10 = vmpackc.low %vm4561_vm13, %vm4544_vm11  ;;  %617 = vmatmul.bf16.gmra.mxu1 %v539_v5 }
  0xdb   : > { %vm4609_vm5 = vcmp.ne.s32.totalorder %v5805_v27, %v3532_v17  ;;  %v1143_v45 = vunpack.c.l.b16 %v1104_v52  ;;  %v334_v27 = vld [vmem:[%s3260_s12 + $0x18] sm:$0xf]  ;;  %v5811_v47 = vunpack.c.l.b16 %v4245_v6  ;;  %vm2288_vm14 = vmpackc.low %vm4575_vm9, %vm4568_vm6  ;;  %v2328_v25 = vsel %vm2281_vm10, %v4556_v62, 0 }
  0xdc   : > { %vm4616_vm7 = vcmp.ne.s32.totalorder %v5808_v21, %v3535_v18  ;;  %v1144_v21 = vunpack.c.l.b16 %v1105_v15  ;;  %v5814_v52 = vunpack.c.h.b16 %v4245_v6  ;;  %v5818_v36 = vrot.slane %v4064_v35, 1  ;;  %vm779_vm9 = vmpackc.low %vm4602_vm3, %vm4595_vm2 }
  0xdd   : > { %vm4630_vm0 = vcmp.ne.s32.totalorder %v5811_v47, %v3532_v17  ;;  %v5815_v47 = vunpack.c.l.b16 %v4324_v26  ;;  %vm5819_vm6 = vcmask 1046528   ;;  %v2329_v51 = vsel %vm2288_vm14, %v4588_v53, 0 }
  0xde   : > { %vm785_vm11 = vcmp.ne.s32.totalorder %v5814_v52, %v3535_v18  ;;  %v869_v32 = vsel %vm5819_vm6, %v5818_v36, %v5601_v12  ;;  %v2367_v5 = vunpack.c.l.b16 %v2328_v25  ;;  %v5820_v6 = vunpack.c.h.b16 %v4324_v26 }
  0xdf   : > { %vm4646_vm13 = vcmp.ne.s32.totalorder %v5815_v47, %v3532_v17  ;;  %942 = vmatmul.bf16.gmra.mxu2 %v869_v32  ;;  %v4667_v52 = vpack.c.b16 %v1144_v21, %v1143_v45  ;;  %v2368_v35 = vunpack.c.l.b16 %v2329_v51  ;;  %vm786_vm10 = vmpackc.low %vm785_vm11, %vm4630_vm0  ;;  %v814_v48 = vsel %vm779_vm9, %v334_v27, 0 }
  0xe0   : > { %vm4663_vm1 = vcmp.ne.s32.totalorder %v5820_v6, %v3535_v18  ;;  %v5823_v28 = vunpack.c.l.b16 %v4410_v16  ;;  %v5826_v26 = vrot.slane %v4352_v34, 5  ;;  %v815_v21 = vsel %vm786_vm10, %v335_v38, 0  ;;  %vm5844_vm11 = vmmov %vm5819_vm6 }
  0xe1   : > { %v853_v47 = vunpack.c.l.b16 %v814_v48  ;;  %v5827_v44 = vunpack.c.h.b16 %v4410_v16  ;;  %v5600_v36 = vrot.slane %v4667_v52, 1  ;;  %v4693_v32 = vpack.c.b16 %v2368_v35, %v2367_v5  ;;  %v4718_v35 = vld [vmem:[%s3260_s12 + $0x1c] sm:$0xf]  ;;  %v4721_v48 = vld [vmem:[%s3260_s12 + $0x20] sm:$0xf]  ;;  %vm1071_vm14 = vmpackc.low %vm4663_vm1, %vm4646_vm13 }
  0xe2   : > { %vm4674_vm2 = vcmp.ne.s32.totalorder %v5823_v28, %v3532_v17  ;;  %v4683_v45 = vsel %vm5741_vm4, %v4482_v41, %v5826_v26  ;;  %v854_v51 = vunpack.c.l.b16 %v815_v21  ;;  %v5830_v33 = vunpack.c.l.b16 %v4284_v42  ;;  %5835 = vst [vmem:[#allocation14_spill] sm:$0xff] %v4718_v35  ;;  %v4894_v41 = vld [vmem:[%s3260_s12 + $0x28] sm:$0xf] }
  0xe3   : > { %vm4688_vm3 = vcmp.ne.s32.totalorder %v5827_v44, %v3535_v18  ;;  %v5833_v16 = vsel %vm4360_vm8, %v4461_v57, 0  ;;  %v5834_v5 = vrot.slane %v4390_v31, 7  ;;  %5836 = vst [vmem:[#allocation15_spill] sm:$0xff] %v4721_v48  ;;  %v5837_v43 = vunpack.c.h.b16 %v4284_v42  ;;  %v4751_v44 = vld [vmem:[%s3260_s12 + $0x24] sm:$0xf] }
  0xe4   : > { %vm1078_vm4 = vmpackc.low %vm4688_vm3, %vm4674_vm2  ;;  %vm4702_vm0 = vcmp.ne.s32.totalorder %v5830_v33, %v3532_v17  ;;  %v4710_v38 = vunpack.c.l.b16 %v5833_v16  ;;  %v5840_v10 = vunpack.c.l.b16 %v4315_v22  ;;  %v5843_v28 = vrot.slane %v4152_v24, 1  ;;  %5845 = vst [vmem:[#allocation16_spill] sm:$0xff] %v4751_v44  ;;  %v4760_v24 = vld [vmem:[%s3260_s12 + $0x20] sm:$0xf] }
  0xe5   : > { %v1021_v6 = vsel %vm5743_vm15, %v3792_v59, %v5834_v5  ;;  %vm4730_vm8 = vcmp.ne.s32.totalorder %v5837_v43, %v3535_v18  ;;  %v5599_v26 = vrot.slane %v4693_v32, 3  ;;  %v4747_v42 = vpack.c.b16 %v854_v51, %v853_v47  ;;  %5847 = vst [vmem:[#allocation17_spill] sm:$0xff] %v4760_v24 }
  0xe6   : > { %vm4737_vm15 = vcmp.ne.s32.totalorder %v5840_v10, %v3532_v17  ;;  %v1160_v25 = vsel %vm5844_vm11, %v5843_v28, %v5600_v36  ;;  %v1107_v21 = vsel %vm1078_vm4, %v4721_v48, 0  ;;  %v5846_v27 = vrot.slane %v4352_v34, 5  ;;  %vm2295_vm6 = vmpackc.low %vm4730_vm8, %vm4702_vm0  ;;  %v3124_v48 = vld [vmem:[%s5560_s1 + $0x1c8] sm:$0xff] }
  0xe7   : > { %v2310_v16 = vunpack.c.l.b16 %v4683_v45  ;;  %v2311_v5 = vunpack.c.h.b16 %v4683_v45  ;;  %1233 = vmatmul.bf16.gmra.mxu3 %v1160_v25  ;;  %v5848_v47 = vunpack.c.h.b16 %v4315_v22  ;;  %v1086_v51 = vunpack.c.l.b16 %v1021_v6 }
  0xe8   : > { %v4755_v33 = vrot.slane %v5846_v27, 4  ;;  %v1087_v43 = vunpack.c.h.b16 %v1021_v6  ;;  %v5849_v10 = vrot.slane %v4209_v11, 3  ;;  %vm5850_vm10 = vcmask 1044480  }
  0xe9   : > { %vm2301_vm9 = vcmp.ne.s32.totalorder %v5848_v47, %v3535_v18  ;;  %v1106_v28 = vsel %vm1071_vm14, %v4718_v35, 0  ;;  %v5851_v22 = vunpack.c.l.b16 %v3416_v9  ;;  %v5852_v6 = vmov 0  ;;  %v1461_v35 = vld [vmem:[%s3260_s12 + $0x4] sm:$0xc] }
  0xea   : > { %v2385_v45 = vsel %vm5850_vm10, %v5849_v10, %v5599_v26  ;;  %vm2302_vm2 = vmpackc.low %vm2301_vm9, %vm4737_vm15  ;;  %v5854_v11 = vunpack.c.h.b16 %v3416_v9  ;;  %v5855_v15 = vmov 0  ;;  %v1146_v3 = vunpack.c.l.b16 %v1107_v21  ;;  %v3104_v21 = vld [vmem:[%s5560_s1 + $0x150] sm:$0xff] }
  0xeb   : > { %vm4785_vm3 = vcmp.ne.s32.totalorder %v5851_v22, %v3532_v17  ;;  %2458 = vmatmul.bf16.gmra.mxu0 %v2385_v45  ;;  %v2331_v59 = vsel %vm2302_vm2, %v4751_v44, 0  ;;  %v5857_v25 = vunpack.c.l.b16 %v4458_v37  ;;  %v5860_v47 = vunpack.c.h.b16 %v4458_v37  ;;  %v3117_v10 = vld [vmem:[%s5560_s1 + $0x190] sm:$0xff]  ;;  %v5863_v37 = vld [vmem:[#allocation3_spill] sm:$0xff]  ;;  %1697 = vmatpush.bf16.msra.mxu1 %v3104_v21  ;;  %v5025_v21 = vld [vmem:[%s3260_s12 + $0x24] sm:$0xf] }
  0xec   : > { %v5853_v6 = vsel %vm4785_vm3, 4294967295, %v5852_v6  ;;  %vm4792_vm4 = vcmp.ne.s32.totalorder %v5854_v11, %v3535_v18  ;;  %v3125_v45 = vld [vmem:[%s5560_s1 + $0x1d0] sm:$0xff]  ;;  %v5864_v22 = vunpack.c.l.b16 %v5863_v37  ;;  %v5865_v11 = vmov 0  ;;  %1978 = vmatpush.bf16.msra.mxu2 %v3117_v10 }
  0xed   : > { %v5856_v15 = vsel %vm4792_vm4, 4294967295, %v5855_v15  ;;  %vm4800_vm13 = vcmp.ne.s32.totalorder %v5857_v25, %v3532_v17  ;;  %vm4807_vm1 = vcmp.ne.s32.totalorder %v5860_v47, %v3535_v18  ;;  %v5867_v25 = vunpack.c.h.b16 %v5863_v37  ;;  %2175 = vmatpush.bf16.msrb.mxu3 %v3125_v45 }
  0xee   : > { %vm4827_vm15 = vcmp.ne.s32.totalorder %v5864_v22, %v3532_v17  ;;  %v5868_v47 = vmov 0  ;;  %v2330_v36 = vsel %vm2295_vm6, %v4760_v24, 0  ;;  %v337_v22 = vld [vmem:[%s3260_s12 + $0x24] sm:$0xf]  ;;  %v5870_v12 = vunpack.c.l.b16 %v4422_v2  ;;  %v5891_v24 = vld [vmem:[#allocation7_spill] sm:$0xff] }
  0xef   : > { %v5866_v11 = vsel %vm4827_vm15, 4294967295, %v5865_v11  ;;  %vm4834_vm11 = vcmp.ne.s32.totalorder %v5867_v25, %v3535_v18  ;;  %v5873_v25 = vunpack.c.h.b16 %v4422_v2  ;;  %v5876_v57 = vrot.slane %v4390_v31, 7 }
  0xf0   : > { %v5869_v47 = vsel %vm4834_vm11, 4294967295, %v5868_v47  ;;  %vm4849_vm9 = vcmp.ne.s32.totalorder %v5870_v12, %v3532_v17  ;;  %v1145_v55 = vunpack.c.l.b16 %v1106_v28  ;;  %v5877_v2 = vunpack.c.l.b16 %v4443_v30  ;;  %v3116_v28 = vld [vmem:[%s5560_s1 + $0x188] sm:$0xff]  ;;  %vm5896_vm11 = vmpackc.low %vm4807_vm1, %vm4800_vm13 }
  0xf1   : > { %vm4856_vm10 = vcmp.ne.s32.totalorder %v5873_v25, %v3535_v18  ;;  %v4863_v63 = vrot.slane %v5876_v57, 4  ;;  %v3103_v25 = vld [vmem:[%s5560_s1 + $0x148] sm:$0xff]  ;;  %vm4884_vm6 = vcmp.ne.s32.totalorder %v1086_v51, %v3532_v17  ;;  %vm4889_vm2 = vcmp.ne.s32.totalorder %v1087_v43, %v3535_v18  ;;  %v5884_v57 = vld [vmem:[#allocation6_spill] sm:$0xff]  ;;  %1979 = vmatpush.bf16.msra.mxu2 %v3116_v28  ;;  %vm5900_vm13 = vmpackc.low %vm4616_vm7, %vm4609_vm5  ;;  %2176 = vmatpush.bf16.msrb.mxu3 %v3124_v48 }
  0xf2   : > { %vm4872_vm8 = vcmp.ne.s32.totalorder %v5877_v2, %v3532_v17  ;;  %v2370_v10 = vunpack.c.l.b16 %v2331_v59  ;;  %v5885_v51 = vunpack.c.l.b16 %v5884_v57  ;;  %v5886_v34 = vmov 0  ;;  %1698 = vmatpush.bf16.msra.mxu1 %v3103_v25  ;;  %vm1092_vm5 = vmpackc.low %vm4889_vm2, %vm4884_vm6 }
  0xf3   : > { %v5888_v43 = vunpack.c.h.b16 %v5884_v57  ;;  %v5889_v59 = vmov 0  ;;  %v4914_v45 = vpack.c.b16 %v1146_v3, %v1145_v55  ;;  %v2369_v44 = vunpack.c.l.b16 %v2330_v36  ;;  %v3102_v3 = vld [vmem:[%s5560_s1 + $0x140] sm:$0xff] }
  0xf4   : > { %vm4903_vm14 = vcmp.ne.s32.totalorder %v5885_v51, %v3532_v17  ;;  %v540_v19 = vpack.c.b16 %v4710_v38, %v5891_v24  ;;  %v4924_v51 = vld [vmem:[%s3260_s12 + $0x2c] sm:$0xf]  ;;  %v5892_v57 = vunpack.c.h.b16 %v4443_v30  ;;  %v5894_v55 = vrot.slane %v4548_v40, 1 }
  0xf5   : > { %v5887_v34 = vsel %vm4903_vm14, 4294967295, %v5886_v34  ;;  %vm4910_vm0 = vcmp.ne.s32.totalorder %v5888_v43, %v3535_v18  ;;  %v5893_v43 = vrot.slane %v4747_v42, 1  ;;  %v817_v38 = vsel %vm5896_vm11, %v337_v22, 0 }
  0xf6   : > { %v5890_v59 = vsel %vm4910_vm0, 4294967295, %v5889_v59  ;;  %vm2308_vm14 = vcmp.ne.s32.totalorder %v5892_v57, %v3535_v18  ;;  %vm5895_vm0 = vcmask 1046528   ;;  %vm2314_vm15 = vcmp.ne.s32.totalorder %v2310_v16, %v3532_v17  ;;  %622 = vmatmul.bf16.gmra.mxu1 %v540_v19 }
  0xf7   : > { %v871_v36 = vsel %vm5895_vm0, %v5894_v55, %v5893_v43  ;;  %vm2309_vm12 = vmpackc.low %vm2308_vm14, %vm4872_vm8  ;;  %vm2315_vm4 = vcmp.ne.s32.totalorder %v2311_v5, %v3535_v18  ;;  %v5897_v30 = vunpack.c.l.b16 %v4416_v46  ;;  %v1571_v16 = vsel %vm5900_vm13, %v1461_v35, 0  ;;  %v4979_v35 = vld [vmem:[%s3260_s12 + $0x28] sm:$0xf]  ;;  %1699 = vmatpush.bf16.msra.mxu1 %v3102_v3 }
  0xf8   : > { %vm2316_vm0 = vmpackc.low %vm2315_vm4, %vm2314_vm15  ;;  %v2332_v24 = vsel %vm2309_vm12, %v4894_v41, 0  ;;  %v5901_v5 = vunpack.c.l.b16 %v4385_v29  ;;  %v5902_v27 = vunpack.c.l.b16 %v4374_v56  ;;  %v2377_v22 = vpack.c.b16 %v2370_v10, %v2369_v44  ;;  %947 = vmatmul.bf16.gmra.mxu2 %v871_v36 }
  0xf9   : > { %vm4946_vm3 = vcmp.ne.s32.totalorder %v5897_v30, %v3532_v17  ;;  %vm5903_vm12 = vmpackc.low %vm4856_vm10, %vm4849_vm9  ;;  %v5904_v50 = vunpack.c.h.b16 %v4416_v46  ;;  %v2333_v29 = vsel %vm2316_vm0, %v4924_v51, 0  ;;  %v856_v56 = vunpack.c.l.b16 %v817_v38  ;;  %v5911_v38 = vld [vmem:[#allocation8_spill] sm:$0xff] }
  0xfa   : > { %v4963_v9 = vpack.c.b16 %v5902_v27, %v5901_v5  ;;  %v816_v12 = vsel %vm5903_vm12, %v336_v14, 0  ;;  %v2371_v19 = vunpack.c.l.b16 %v2332_v24  ;;  %v2372_v14 = vunpack.c.l.b16 %v2333_v29 }
  0xfb   : > { %vm4973_vm4 = vcmp.ne.s32.totalorder %v5904_v50, %v3535_v18  ;;  %v1610_v26 = vunpack.c.l.b16 %v1571_v16  ;;  %v1093_v46 = vunpack.c.l.b16 %v4863_v63  ;;  %v1094_v44 = vunpack.c.h.b16 %v4863_v63 }
  0xfc   : > { %v5907_v37 = vrot.slane %v4390_v31, 6  ;;  %v1161_v48 = vrot.slane %v4914_v45, 1  ;;  %v855_v28 = vunpack.c.l.b16 %v816_v12  ;;  %vm1085_vm7 = vmpackc.low %vm4973_vm4, %vm4946_vm3  ;;  %v4996_v10 = vpack.c.b16 %v2372_v14, %v2371_v19  ;;  %v5073_v19 = vld [vmem:[%s3260_s12 + $0x30] sm:$0x7] }
  0xfd   : > { %v5908_v57 = vunpack.c.l.b16 %v4347_v8  ;;  %v1629_v31 = vrot.slane %v4963_v9, 2  ;;  %vm5909_vm1 = vnez %v5853_v6  ;;  %vm5910_vm14 = vnez %v5856_v15  ;;  %v5976_v6 = vld [vmem:[#allocation11_spill] sm:$0xff] }
  0xfe   : > { %v4989_v25 = vrot.slane %v5907_v37, 4  ;;  %vm1796_vm15 = vmpackc.low %vm5910_vm14, %vm5909_vm1  ;;  %v2386_v55 = vrot.slane %v2377_v22, 3  ;;  %v1109_v36 = vsel %vm1092_vm5, %v4979_v35, 0  ;;  %vm5621_vm11 = vcmask 1045504  }
  0xff   : > { %v1621_v43 = vpack.c.b16 %v5908_v57, %v1610_v26  ;;  %v5912_v8 = vunpack.c.l.b16 %v5911_v38  ;;  %vm5915_vm10 = vnez %v5866_v11  ;;  %vm5916_vm8 = vnez %v5869_v47  ;;  %v5932_v26 = vld [vmem:[#allocation4_spill] sm:$0xff] }
 0x100   : > { %vm1782_vm0 = vmpackc.low %vm5916_vm8, %vm5915_vm10  ;;  %v5022_v24 = vpack.c.b16 %v856_v56, %v855_v28  ;;  %v2388_v2 = vrot.slane %v4996_v10, 3  ;;  %v5917_v16 = vunpack.c.h.b16 %v5911_v38  ;;  %v5920_v27 = vrot.slane %v4667_v52, 1  ;;  %v5966_v52 = vld [vmem:[#allocation10_spill] sm:$0xff] }
 0x101   : > { %vm5014_vm9 = vcmp.ne.s32.totalorder %v5912_v8, %v3532_v17  ;;  %v1628_v3 = vrot.slane %v1621_v43, 2  ;;  %vm5921_vm2 = vcmask 1046528   ;;  %v1108_v12 = vsel %vm1085_vm7, %v5025_v21, 0 }
 0x102   : > { %vm5031_vm6 = vcmp.ne.s32.totalorder %v5917_v16, %v3535_v18  ;;  %v1162_v22 = vsel %vm5921_vm2, %v5920_v27, %v1161_v48  ;;  %v5922_v50 = vunpack.c.l.b16 %v4128_v39  ;;  %v5925_v13 = vunpack.c.h.b16 %v4128_v39 }
 0x103   : > { %vm1528_vm13 = vmpackc.low %vm5031_vm6, %vm5014_vm9  ;;  %1238 = vmatmul.bf16.gmra.mxu3 %v1162_v22  ;;  %vm5928_vm3 = vcmask 1044480   ;;  %v1630_v56 = vsel %vm5621_vm11, %v1628_v3, %v1629_v31  ;;  %v5929_v14 = vunpack.c.l.b16 %v4755_v33  ;;  %v5933_v37 = vunpack.c.l.b16 %v5932_v26  ;;  %v1736_v3 = vld [vmem:[%s3260_s12 + $0x8] sm:$0xc] }
 0x104   : > { %vm5053_vm12 = vcmp.ne.s32.totalorder %v5922_v50, %v3532_v17  ;;  %vm5060_vm5 = vcmp.ne.s32.totalorder %v5925_v13, %v3535_v18  ;;  %v5067_v29 = vsel %vm5928_vm3, %v2386_v55, %v2388_v2  ;;  %vm5936_vm6 = vnez %v5887_v34 }
 0x105   : > { %vm5078_vm4 = vcmp.ne.s32.totalorder %v5929_v14, %v3532_v17  ;;  %vm1535_vm7 = vmpackc.low %vm5060_vm5, %vm5053_vm12  ;;  %vm5089_vm9 = vcmp.ne.s32.totalorder %v5933_v37, %v3532_v17  ;;  %vm5937_vm2 = vnez %v5890_v59  ;;  %v5938_v57 = vrot.slane %v4693_v32, 3  ;;  %v3115_v32 = vld [vmem:[%s5560_s1 + $0x180] sm:$0xff]  ;;  %v5155_v37 = vpop.f32.mrf.mxu1 }
 0x106   : > { %vm1803_vm3 = vmpackc.low %vm5937_vm2, %vm5936_vm6  ;;  %vm5939_vm11 = vcmask 1044480   ;;  %v1148_v38 = vunpack.c.l.b16 %v1109_v36  ;;  %v5940_v8 = vunpack.c.h.b16 %v4755_v33  ;;  %v1575_v30 = vsel %vm1528_vm13, %v4551_v7, 0  ;;  %1980 = vmatpush.bf16.msra.mxu2 %v3115_v32  ;;  %1700 = vmatmul.bf16.vlgmr.msra.gmra.mxu1 %v1630_v56  ;;  %v3170_v32 = vld [vmem:[%s3260_s12 + $0x28] sm:$0x1] }
 0x107   : > { %v2387_v43 = vsel %vm5939_vm11, %v5938_v57, %v2386_v55  ;;  %v872_v16 = vrot.slane %v5022_v24, 1  ;;  %v1147_v5 = vunpack.c.l.b16 %v1108_v12  ;;  %v3123_v55 = vld [vmem:[%s5560_s1 + $0x1c0] sm:$0xff]  ;;  %v1576_v33 = vsel %vm1535_vm7, %v4580_v58, 0  ;;  %v3111_v24 = vld [vmem:[%s3260_s12 + $0x10] sm:$0xff] }
 0x108   : > { %vm2322_vm12 = vcmp.ne.s32.totalorder %v5940_v8, %v3535_v18  ;;  %2463 = vmatmul.bf16.gmra.mxu0 %v2387_v43  ;;  %v5941_v7 = vunpack.c.h.b16 %v5932_v26  ;;  %v5942_v36 = vunpack.c.l.b16 %v4445_v61  ;;  %v1614_v12 = vunpack.c.l.b16 %v1575_v30  ;;  %2177 = vmatpush.bf16.msrb.mxu3 %v3123_v55 }
 0x109   : > { %vm2323_vm5 = vmpackc.low %vm2322_vm12, %vm5078_vm4  ;;  %v1615_v50 = vunpack.c.l.b16 %v1576_v33  ;;  %v5945_v58 = vunpack.c.h.b16 %v4445_v61  ;;  %v1853_v40 = vsel %vm1782_vm0, %v1736_v3, 0  ;;  %v1855_v61 = vsel %vm1796_vm15, %v4163_v0, 0 }
 0x10a   : > { %vm1788_vm11 = vcmp.ne.s32.totalorder %v5941_v7, %v3535_v18  ;;  %vm5121_vm13 = vcmp.ne.s32.totalorder %v5942_v36, %v3532_v17  ;;  %v2334_v22 = vsel %vm2323_vm5, %v5073_v19, 0  ;;  %v1856_v11 = vsel %vm1803_vm3, %v4137_v4, 0  ;;  %v983_v7 = vld [vmem:[%s3260_s12 + $0x2c] sm:$0x1] }
 0x10b   : > { %vm1789_vm4 = vmpackc.low %vm1788_vm11, %vm5089_vm9  ;;  %vm5131_vm7 = vcmp.ne.s32.totalorder %v5945_v58, %v3535_v18  ;;  %v2373_v13 = vunpack.c.l.b16 %v2334_v22  ;;  %v5141_v39 = vpack.c.b16 %v1615_v50, %v1614_v12  ;;  %v1892_v47 = vunpack.c.l.b16 %v1853_v40  ;;  %v5965_v12 = vld [vmem:[#allocation9_spill] sm:$0xff] }
 0x10c   : > { %v1854_v14 = vsel %vm1789_vm4, %v4134_v49, 0  ;;  %v1894_v28 = vunpack.c.l.b16 %v1855_v61  ;;  %v1895_v57 = vunpack.c.l.b16 %v1856_v11  ;;  %vm5160_vm10 = vcmp.ne.s32.totalorder %v1093_v46, %v3532_v17  ;;  %vm807_vm14 = vmpackc.low %vm5131_vm7, %vm5121_vm13 }
 0x10d   : > { %v2379_v26 = vpack.c.b16 %v2373_v13, %v2373_v13  ;;  %v1893_v49 = vunpack.c.l.b16 %v1854_v14  ;;  %v1839_v0 = vunpack.c.l.b16 %v4471_v1  ;;  %v5165_v15 = vpack.c.b16 %v1148_v38, %v1147_v5  ;;  %v5275_v45 = vpop.f32.mrf.mxu1 }
 0x10e   : > { %v1631_v4 = vrot.slane %v5141_v39, 2  ;;  %vm5171_vm1 = vcmp.ne.s32.totalorder %v1094_v44, %v3535_v18  ;;  %v1904_v43 = vpack.c.b16 %v1895_v57, %v1894_v28  ;;  %v1840_v38 = vunpack.c.h.b16 %v4471_v1 }
 0x10f   : > { %v2390_v59 = vrot.slane %v2379_v26, 3  ;;  %v1903_v46 = vpack.c.b16 %v1893_v49, %v1892_v47  ;;  %vm5952_vm15 = vcmask 1045504   ;;  %v5953_v44 = vunpack.c.l.b16 %v3748_v60  ;;  %vm1099_vm3 = vmpackc.low %vm5171_vm1, %vm5160_vm10  ;;  %v2952_v26 = vld [vmem:[%s3260_s12 + $0x8] sm:$0xc]  ;;  %v3110_v49 = vld [vmem:[%s3260_s12 + $0x8] sm:$0xf0] }
 0x110   : > { %v5185_v63 = vsel %vm5952_vm15, %v1629_v31, %v1631_v4  ;;  %v5956_v30 = vunpack.c.h.b16 %v3748_v60  ;;  %v5959_v9 = vrot.slane %v4747_v42, 1  ;;  %vm5960_vm9 = vcmask 1046528   ;;  %vm5964_vm11 = vmmov %vm5952_vm15 }
 0x111   : > { %vm5190_vm8 = vcmp.ne.s32.totalorder %v5953_v44, %v3532_v17  ;;  %vm5961_vm6 = vcmask 1044480   ;;  %v1909_v3 = vrot.slane %v1903_v46, 2  ;;  %v1910_v5 = vrot.slane %v1904_v43, 2 }
 0x112   : > { %vm5197_vm0 = vcmp.ne.s32.totalorder %v5956_v30, %v3535_v18  ;;  %v873_v31 = vsel %vm5960_vm9, %v5959_v9, %v872_v16  ;;  %v5209_v56 = vsel %vm5961_vm6, %v2388_v2, %v2390_v59  ;;  %v1163_v60 = vrot.slane %v5165_v15, 1  ;;  %v1746_v9 = vld [vmem:[%s3260_s12 + $0x30] sm:$0x3] }
 0x113   : > { %vm1810_vm2 = vmpackc.low %vm5197_vm0, %vm5190_vm8  ;;  %952 = vmatmul.bf16.gmra.mxu2 %v873_v31  ;;  %v818_v42 = vsel %vm807_vm14, %v3170_v32, 0  ;;  %v5962_v10 = vunpack.c.l.b16 %v3784_v20  ;;  %v5963_v2 = vunpack.c.h.b16 %v3784_v20  ;;  %v1846_v55 = vunpack.c.l.b16 %v4989_v25 }
 0x114   : > { %v1847_v33 = vunpack.c.h.b16 %v4989_v25  ;;  %v5236_v36 = vsel %vm5964_vm11, %v1909_v3, %v1910_v5  ;;  %v1857_v27 = vsel %vm1810_vm2, %v4556_v62, 0  ;;  %v1544_v22 = vunpack.c.h.b16 %v4274_v54  ;;  %vm5971_vm14 = vmmov %vm5960_vm9 }
 0x115   : > { %vm1815_vm12 = vcmp.ne.s32.totalorder %v5962_v10, %v3532_v17  ;;  %vm1816_vm5 = vcmp.ne.s32.totalorder %v5963_v2, %v3535_v18  ;;  %v1818_v50 = vunpack.c.l.b16 %v5965_v12  ;;  %v1819_v58 = vunpack.c.h.b16 %v5965_v12  ;;  %v5342_v10 = vpop.f32.mrf.mxu0 }
 0x116   : > { %vm1817_vm13 = vmpackc.low %vm1816_vm5, %vm1815_vm12  ;;  %v1825_v13 = vunpack.c.l.b16 %v5966_v52  ;;  %v857_v40 = vunpack.c.l.b16 %v818_v42  ;;  %v1896_v14 = vunpack.c.l.b16 %v1857_v27  ;;  %vm5245_vm4 = vcmp.ne.s32.totalorder %v1839_v0, %v3532_v17  ;;  %1705 = vmatmul.bf16.gmra.mxu1 %v5185_v63 }
 0x117   : > { %v1858_v20 = vsel %vm1817_vm13, %v4588_v53, 0  ;;  %vm5250_vm7 = vcmp.ne.s32.totalorder %v1840_v38, %v3535_v18  ;;  %v1164_v53 = vsel %vm5971_vm14, %v1161_v48, %v1163_v60  ;;  %v1110_v11 = vsel %vm1099_vm3, %v983_v7, 0  ;;  %vm5987_vm12 = vmmov %vm5964_vm11 }
 0x118   : > { %v1897_v25 = vunpack.c.l.b16 %v1858_v20  ;;  %v1826_v47 = vunpack.c.h.b16 %v5966_v52  ;;  %vm5266_vm15 = vcmp.ne.s32.totalorder %v1846_v55, %v3532_v17  ;;  %vm5271_vm8 = vcmp.ne.s32.totalorder %v1847_v33, %v3535_v18  ;;  %1243 = vmatmul.bf16.gmra.mxu3 %v1164_v53  ;;  %2468 = vmatmul.bf16.gmra.mxu0 %v5067_v29  ;;  %vm1845_vm1 = vmpackc.low %vm5250_vm7, %vm5245_vm4  ;;  %v5995_v33 = vld [vmem:[#allocation16_spill] sm:$0xff]  ;;  %v5364_v52 = vpop.f32.mrf.mxu1 }
 0x119   : > { %v1536_v28 = vunpack.c.l.b16 %v4268_v23  ;;  %v1537_v57 = vunpack.c.h.b16 %v4268_v23  ;;  %v1832_v0 = vunpack.c.l.b16 %v5976_v6  ;;  %v1833_v34 = vunpack.c.h.b16 %v5976_v6  ;;  %vm1852_vm3 = vmpackc.low %vm5271_vm8, %vm5266_vm15  ;;  %v6000_v6 = vld [vmem:[#allocation5_spill] sm:$0xff] }
 0x11a   : > { %v5277_v48 = vpack.c.b16 %v1897_v25, %v1896_v14  ;;  %v863_v59 = vpack.c.b16 %v857_v40, %v857_v40  ;;  %v1149_v46 = vunpack.c.l.b16 %v1110_v11  ;;  %vm5286_vm10 = vcmp.ne.s32.totalorder %v1818_v50, %v3532_v17 }
 0x11b   : > { %v5979_v23 = vunpack.c.l.b16 %v4274_v54  ;;  %vm5302_vm9 = vcmp.ne.s32.totalorder %v1544_v22, %v3535_v18  ;;  %vm1823_vm6 = vcmp.ne.s32.totalorder %v1819_v58, %v3535_v18  ;;  %vm5308_vm2 = vcmp.ne.s32.totalorder %v1825_v13, %v3532_v17  ;;  %v5986_v54 = vld [vmem:[#allocation12_spill] sm:$0xff]  ;;  %v5996_v58 = vld [vmem:[#allocation13_spill] sm:$0xff] }
 0x11c   : > { %v1912_v43 = vrot.slane %v5277_v48, 2  ;;  %v1488_v30 = vrot.slane %v5986_v54, 6  ;;  %vm1824_vm5 = vmpackc.low %vm1823_vm6, %vm5286_vm10  ;;  %vm1830_vm11 = vcmp.ne.s32.totalorder %v1826_v47, %v3535_v18  ;;  %vm5325_vm13 = vcmp.ne.s32.totalorder %v1536_v28, %v3532_v17  ;;  %v5999_v48 = vld [vmem:[#allocation14_spill] sm:$0xff] }
 0x11d   : > { %vm5297_vm0 = vcmp.ne.s32.totalorder %v5979_v23, %v3532_v17  ;;  %vm5330_vm14 = vcmp.ne.s32.totalorder %v1537_v57, %v3535_v18  ;;  %vm5338_vm10 = vcmp.ne.s32.totalorder %v1832_v0, %v3532_v17  ;;  %v874_v2 = vrot.slane %v863_v59, 1  ;;  %v6002_v59 = vld [vmem:[#allocation2_spill] sm:$0xff] }
 0x11e   : > { %v5318_v1 = vsel %vm5987_vm12, %v1910_v5, %v1912_v43  ;;  %vm1831_vm12 = vmpackc.low %vm1830_vm11, %vm5308_vm2  ;;  %v5992_v5 = vld [vmem:[#allocation17_spill] sm:$0xff]  ;;  %v1155_v55 = vpack.c.b16 %v1149_v46, %v1149_v46  ;;  %vm1837_vm2 = vcmp.ne.s32.totalorder %v1833_v34, %v3535_v18  ;;  %v1862_v12 = vsel %vm1845_vm1, %v4924_v51, 0  ;;  %v5997_v51 = vld [vmem:[#allocation15_spill] sm:$0xff] }
 0x11f   : > { %v1859_v32 = vsel %vm1824_vm5, %v5992_v5, 0  ;;  %vm1549_vm6 = vmpackc.low %vm5302_vm9, %vm5297_vm0  ;;  %v1860_v7 = vsel %vm1831_vm12, %v5995_v33, 0  ;;  %v1863_v50 = vsel %vm1852_vm3, %v1746_v9, 0  ;;  %v1491_v20 = vrot.slane %v5996_v58, 6 }
 0x120   : > { %v1898_v27 = vunpack.c.l.b16 %v1859_v32  ;;  %v1899_v22 = vunpack.c.l.b16 %v1860_v7  ;;  %vm1838_vm5 = vmpackc.low %vm1837_vm2, %vm5338_vm10  ;;  %v1901_v40 = vunpack.c.l.b16 %v1862_v12  ;;  %v1578_v14 = vsel %vm1549_vm6, %v5997_v51, 0  ;;  %v5397_v32 = vpop.f32.mrf.mxu0 }
 0x121   : > { %vm1542_vm0 = vmpackc.low %vm5330_vm14, %vm5325_vm13  ;;  %v1861_v13 = vsel %vm1838_vm5, %v4894_v41, 0  ;;  %v1902_v62 = vunpack.c.l.b16 %v1863_v50  ;;  %v1490_v53 = vrot.slane %v1488_v30, 4  ;;  %vm5998_vm4 = vcmask 1046528  }
 0x122   : > { %v1906_v25 = vpack.c.b16 %v1899_v22, %v1898_v27  ;;  %v1900_v61 = vunpack.c.l.b16 %v1861_v13  ;;  %v875_v11 = vsel %vm5998_vm4, %v872_v16, %v874_v2  ;;  %v1165_v47 = vrot.slane %v1155_v55, 1  ;;  %vm6005_vm8 = vmmov %vm5998_vm4  ;;  %v5399_v55 = vpop.f32.mrf.mxu1 }
 0x123   : > { %957 = vmatmul.bf16.gmra.mxu2 %v875_v11  ;;  %v1577_v41 = vsel %vm1542_vm0, %v5999_v48, 0  ;;  %v1908_v63 = vpack.c.b16 %v1902_v62, %v1902_v62  ;;  %v6001_v0 = vrot.slane %v6000_v6, 6  ;;  %vm6003_vm7 = vnez %v6002_v59  ;;  %v5437_v6 = vpop.f32.mrf.mxu2 }
 0x124   : > { %v1914_v28 = vrot.slane %v1906_v25, 2  ;;  %v1907_v57 = vpack.c.b16 %v1901_v40, %v1900_v61  ;;  %v1492_v46 = vsel %vm6003_vm7, %v1490_v53, %v1491_v20  ;;  %v1617_v38 = vunpack.c.l.b16 %v1578_v14 }
 0x125   : > { %v1487_v34 = vrot.slane %v6001_v0, 4  ;;  %v2953_v16 = vor.u32 %v3110_v49, %v2952_v26  ;;  %vm6004_vm15 = vcmask 1045504   ;;  %v1616_v8 = vunpack.c.l.b16 %v1577_v41  ;;  %v3112_v26 = vld [vmem:[%s3260_s12 + $0x18] sm:$0xff] }
 0x126   : > { %v5387_v23 = vsel %vm6004_vm15, %v1912_v43, %v1914_v28  ;;  %v1916_v44 = vrot.slane %v1907_v57, 2  ;;  %v1918_v54 = vrot.slane %v1908_v63, 2  ;;  %v1557_v9 = vunpack.c.l.b16 %v1492_v46  ;;  %vm6006_vm1 = vmmov %vm6004_vm15 }
 0x127   : > { %v1489_v29 = vsel %vm6003_vm7, %v1487_v34, %v1488_v30  ;;  %v1558_v31 = vunpack.c.h.b16 %v1492_v46  ;;  %v1166_v3 = vsel %vm6005_vm8, %v1163_v60, %v1165_v47  ;;  %v2073_v43 = vshrl.u32 %v3111_v24, 16  ;;  %vm6007_vm9 = vmmov %vm6006_vm1  ;;  %v3171_v46 = vld [vmem:[%s3260_s12 + $0x2c] sm:$0x3] }
 0x128   : > { %v5395_v5 = vsel %vm6006_vm1, %v1914_v28, %v1916_v44  ;;  %1248 = vmatmul.bf16.gmra.mxu3 %v1166_v3  ;;  %v2076_v42 = vshll.u32 %v3111_v24, 16  ;;  %v1624_v2 = vpack.c.b16 %v1617_v38, %v1616_v8  ;;  %v5402_v30 = vsel %vm6007_vm9, %v1916_v44, %v1918_v54  ;;  %2473 = vmatmul.bf16.gmra.mxu0 %v5209_v56  ;;  %vm6012_vm10 = vmmov %vm6006_vm1  ;;  %v5425_v53 = vpop.f32.mrf.mxu0  ;;  %v3113_v38 = vld [vmem:[%s3260_s12 + $0x20] sm:$0xff] }
 0x129   : > { %v1550_v33 = vunpack.c.l.b16 %v1489_v29  ;;  %v1551_v7 = vunpack.c.h.b16 %v1489_v29  ;;  %v2065_v27 = vshrl.u32 %v2953_v16, 16  ;;  %v2068_v15 = vshll.u32 %v2953_v16, 16  ;;  %vm6013_vm7 = vmmov %vm6006_vm1 }
 0x12a   : > { %vm5406_vm3 = vcmp.ne.s32.totalorder %v1557_v9, %v3532_v17  ;;  %vm5411_vm11 = vcmp.ne.s32.totalorder %v1558_v31, %v3535_v18  ;;  %v2075_v12 = vrot.slane %v2073_v43, 2  ;;  %v2078_v50 = vrot.slane %v2076_v42, 3  ;;  %v603_v14 = vpop.f32.mrf.mxu1  ;;  %vm6014_vm15 = vmmov %vm6006_vm1 }
 0x12b   : > { %v1633_v13 = vrot.slane %v1624_v2, 2  ;;  %v2067_v40 = vrot.slane %v2065_v27, 2  ;;  %v2070_v51 = vrot.slane %v2068_v15, 3  ;;  %vm1554_vm13 = vcmp.ne.s32.totalorder %v1550_v33, %v3532_v17  ;;  %vm1563_vm12 = vmpackc.low %vm5411_vm11, %vm5406_vm3  ;;  %v5446_v54 = vpop.f32.mrf.mxu2  ;;  %v3114_v2 = vld [vmem:[%s3260_s12 + $0x28] sm:$0xff]  ;;  %s3156_s12 = smul.u32 80, %s6016_s16 }
 0x12c   : > { %vm1555_vm14 = vcmp.ne.s32.totalorder %v1551_v7, %v3535_v18  ;;  %v2079_v61 = vor.u32 %v2078_v50, %v2075_v12  ;;  %v1580_v62 = vsel %vm1563_vm12, %v4979_v35, 0  ;;  %vm2063_vm2 = vsmask.f32 5376 }
 0x12d   : > { %v1634_v56 = vsel %vm6012_vm10, %v1631_v4, %v1633_v13  ;;  %vm1556_vm6 = vmpackc.low %vm1555_vm14, %vm1554_vm13  ;;  %v2071_v25 = vor.u32 %v2070_v51, %v2067_v40  ;;  %v1493_v11 = vrot.slane %v1491_v20, 4  ;;  %v1619_v39 = vunpack.c.l.b16 %v1580_v62  ;;  %s5518_s27 = scalar_lea.vmem %s5563_s4, %s3156_s12 }
 0x12e   : > { %1710 = vmatmul.bf16.gmra.mxu1 %v1634_v56  ;;  %v1579_v47 = vsel %vm1556_vm6, %v5025_v21, 0  ;;  %v2082_v57 = vshrl.u32 %v3112_v26, 16  ;;  %v2085_v63 = vshll.u32 %v3112_v26, 16  ;;  %v2091_v29 = vshrl.u32 %v3113_v38, 16 }
 0x12f   : > { %v2080_v4 = vsel %vm2063_vm2, %v2071_v25, %v2079_v61  ;;  %v1618_v49 = vunpack.c.l.b16 %v1579_v47  ;;  %v1564_v48 = vunpack.c.l.b16 %v1493_v11  ;;  %v1565_v41 = vunpack.c.h.b16 %v1493_v11 }
 0x130   : > { %v2084_v58 = vrot.slane %v2082_v57, 2  ;;  %v2087_v20 = vrot.slane %v2085_v63, 3  ;;  %v2094_v8 = vshll.u32 %v3113_v38, 16  ;;  %v2093_v3 = vrot.slane %v2091_v29, 2 }
 0x131   : > { %v1625_v28 = vpack.c.b16 %v1619_v39, %v1618_v49  ;;  %vm1568_vm5 = vcmp.ne.s32.totalorder %v1564_v48, %v3532_v17  ;;  %vm1569_vm0 = vcmp.ne.s32.totalorder %v1565_v41, %v3535_v18  ;;  %v2056_v42 = vunpack.c.l.b16 %v5073_v19 }
 0x132   : > { %v605_v35 = vpop.f32.mrf.mxu1  ;;  %vm1570_vm4 = vmpackc.low %vm1569_vm0, %vm1568_vm5  ;;  %v2088_v59 = vor.u32 %v2087_v20, %v2084_v58  ;;  %v2096_v43 = vrot.slane %v2094_v8, 3  ;;  %v604_v7 = vadd.f32 %v603_v14, %v5342_v10  ;;  %v2100_v22 = vshrl.u32 %v3114_v2, 16 }
 0x133   : > { %1981 = vmatmul.bf16.vlgmr.msra.gmra.mxu2 %v5236_v36  ;;  %v5435_v36 = vpop.f32.mrf.mxu0  ;;  %v1635_v21 = vrot.slane %v1625_v28, 2  ;;  %v1581_v24 = vsel %vm1570_vm4, %v3171_v46, 0  ;;  %v2062_v60 = vpack.c.b16 %v2056_v42, %v2056_v42  ;;  %v2103_v12 = vshll.u32 %v3114_v2, 16 }
 0x134   : > { %v1620_v17 = vunpack.c.l.b16 %v1581_v24  ;;  %v2089_v18 = vsel %vm2063_vm2, %v2079_v61, %v2088_v59  ;;  %v2097_v27 = vor.u32 %v2096_v43, %v2093_v3  ;;  %v2102_v51 = vrot.slane %v2100_v22, 2 }
 0x135   : > { %v1636_v0 = vsel %vm6013_vm7, %v1633_v13, %v1635_v21  ;;  %v2105_v56 = vrot.slane %v2103_v12, 3  ;;  %v2109_v25 = vshrl.u32 %v2062_v60, 16  ;;  %v2112_v61 = vshll.u32 %v2062_v60, 16 }
 0x136   : > { %v1626_v44 = vpack.c.b16 %v1620_v17, %v1620_v17  ;;  %v2098_v40 = vsel %vm2063_vm2, %v2088_v59, %v2097_v27  ;;  %v606_v14 = vadd.f32 %v605_v35, %v5397_v32 }
 0x137   : > { %v2111_v11 = vrot.slane %v2109_v25, 2 }
 0x138   : > { %2178 = vmatmul.bf16.vlgmr.msrb.gmra.mxu3 %v2080_v4  ;;  %v1637_v31 = vrot.slane %v1626_v44, 2  ;;  %v2106_v4 = vor.u32 %v2105_v56, %v2102_v51 }
 0x13a   : > { %v608_v34 = vpop.f32.mrf.mxu1  ;;  %v1638_v33 = vsel %vm6014_vm15, %v1635_v21, %v1637_v31  ;;  %v2107_v35 = vsel %vm2063_vm2, %v2097_v27, %v2106_v4 }
 0x13b   : > { %v5444_v16 = vpop.f32.mrf.mxu0  ;;  %v609_v58 = vadd.f32 %v608_v34, %v5425_v53 }
 0x13c   : > { %v938_v15 = vpop.f32.mrf.mxu2 }
 0x13d   : > { %v963_v50 = vadd.f32 %v938_v15, %v604_v7 }
 0x13e   : > { %1715 = vmatmul.bf16.gmra.mxu1 %v1636_v0 }
 0x142   : > { %v610_v9 = vpop.f32.mrf.mxu1 }
 0x143   : > { %1986 = vmatmul.bf16.gmra.mxu2 %v5318_v1  ;;  %v5450_v1 = vpop.f32.mrf.mxu0  ;;  %v1229_v10 = vpop.f32.mrf.mxu3  ;;  %v611_v24 = vadd.f32 %v610_v9, %v5435_v36 }
 0x144   : > { %v5458_v62 = vadd.f32 %v1229_v10, %v963_v50  ;;  %v940_v39 = vpop.f32.mrf.mxu2 }
 0x145   : > { %v964_v26 = vadd.f32 %v940_v39, %v606_v14 }
 0x148   : > { %2183 = vmatmul.bf16.gmra.mxu3 %v2089_v18 }
 0x14a   : > { %v613_v13 = vpop.f32.mrf.mxu1 }
 0x14b   : > { %v614_v19 = vadd.f32 %v613_v13, %v5155_v37  ;;  %v5460_v47 = vpop.f32.mrf.mxu0  ;;  %v1231_v28 = vpop.f32.mrf.mxu3 }
 0x14c   : > { %v5464_v57 = vadd.f32 %v1231_v28, %v964_v26 }
 0x14e   : > { %1720 = vmatmul.bf16.gmra.mxu1 %v1638_v33 }
 0x152   : > { %v615_v48 = vpop.f32.mrf.mxu1 }
 0x153   : > { %1991 = vmatmul.bf16.gmra.mxu2 %v5387_v23  ;;  %v2114_v23 = vrot.slane %v2112_v61, 3  ;;  %v616_v41 = vadd.f32 %v615_v48, %v5275_v45  ;;  %v5467_v32 = vpop.f32.mrf.mxu0 }
 0x155   : > { %v2115_v49 = vor.u32 %v2114_v23, %v2111_v11 }
 0x157   : > { %v2116_v37 = vsel %vm2063_vm2, %v2106_v4, %v2115_v49  ;;  %v1451_v49 = vadd.f32 %v5444_v16, %v5458_v62 }
 0x158   : > { %2188 = vmatmul.bf16.gmra.mxu3 %v2098_v40 }
 0x15a   : > { %v618_v21 = vpop.f32.mrf.mxu1 }
 0x15b   : > { %v5470_v63 = vpop.f32.mrf.mxu0  ;;  %v619_v7 = vadd.f32 %v618_v21, %v5364_v52  ;;  %v1452_v21 = vadd.f32 %v5450_v1, %v5464_v57 }
 0x162   : > { %v943_v20 = vpop.f32.mrf.mxu2  ;;  %v620_v0 = vpop.f32.mrf.mxu1 }
 0x163   : > { %1996 = vmatmul.bf16.gmra.mxu2 %v5395_v5  ;;  %v965_v45 = vadd.f32 %v943_v20, %v609_v58  ;;  %v5474_v59 = vpop.f32.mrf.mxu0  ;;  %v5513_v20 = vld [vmem:[%s5561_s2] ss:$0 sm:$0xff] }
 0x168   : > { %2193 = vmatmul.bf16.gmra.mxu3 %v2107_v35 }
 0x16a   : > { %v1234_v46 = vpop.f32.mrf.mxu3  ;;  %v945_v17 = vpop.f32.mrf.mxu2 }
 0x16b   : > { %v5476_v5 = vadd.f32 %v1234_v46, %v965_v45  ;;  %v966_v38 = vadd.f32 %v945_v17, %v611_v24  ;;  %v5479_v44 = vpop.f32.mrf.mxu0 }
 0x16d   : > { %v1453_v17 = vadd.f32 %v5460_v47, %v5476_v5 }
 0x172   : > { %v1236_v29 = vpop.f32.mrf.mxu3 }
 0x173   : > { %2001 = vmatmul.bf16.gmra.mxu2 %v5402_v30  ;;  %v623_v18 = vpop.f32.mrf.mxu1  ;;  %v5481_v30 = vadd.f32 %v1236_v29, %v966_v38  ;;  %v5484_v43 = vpop.f32.mrf.mxu0 }
 0x174   : > { %v624_v25 = vadd.f32 %v623_v18, %v5437_v6 }
 0x178   : > { %2198 = vmatmul.bf16.gmra.mxu3 %v2116_v37 }
 0x17b   : > { %v948_v53 = vpop.f32.mrf.mxu2  ;;  %v625_v34 = vpop.f32.mrf.mxu1 }
 0x17c   : > { %v967_v8 = vadd.f32 %v948_v53, %v614_v19  ;;  %v626_v31 = vadd.f32 %v625_v34, %v5446_v54  ;;  %v5491_v27 = vpop.f32.mrf.mxu0  ;;  %v621_v54 = vadd.f32 %v620_v0, %v5399_v55 }
 0x183   : > { %v950_v2 = vpop.f32.mrf.mxu2  ;;  %v1701_v19 = vpop.f32.mrf.mxu1 }
 0x184   : > { %v968_v36 = vadd.f32 %v950_v2, %v616_v41  ;;  %v5496_v40 = vpop.f32.mrf.mxu0  ;;  %v1726_v41 = vadd.f32 %v1701_v19, %v1451_v49 }
 0x186   : > { %v1239_v3 = vpop.f32.mrf.mxu3 }
 0x187   : > { %v5486_v42 = vadd.f32 %v1239_v3, %v967_v8 }
 0x18b   : > { %v1703_v14 = vpop.f32.mrf.mxu1 }
 0x18c   : > { %v2454_v10 = vpop.f32.mrf.mxu0  ;;  %v1727_v45 = vadd.f32 %v1703_v14, %v1452_v21 }
 0x18e   : > { %v1241_v9 = vpop.f32.mrf.mxu3 }
 0x18f   : > { %v5488_v33 = vadd.f32 %v1241_v9, %v968_v36  ;;  %v1454_v36 = vadd.f32 %v5467_v32, %v5481_v30 }
 0x191   : > { %v1456_v14 = vadd.f32 %v5474_v59, %v5488_v33 }
 0x193   : > { %v1706_v37 = vpop.f32.mrf.mxu1 }
 0x194   : > { %v2456_v26 = vpop.f32.mrf.mxu0  ;;  %v1728_v38 = vadd.f32 %v1706_v37, %v1453_v17 }
 0x196   : > { %v953_v15 = vpop.f32.mrf.mxu2 }
 0x197   : > { %v969_v60 = vadd.f32 %v953_v15, %v619_v7 }
 0x19b   : > { %v1244_v22 = vpop.f32.mrf.mxu3  ;;  %v1708_v46 = vpop.f32.mrf.mxu1 }
 0x19c   : > { %v5493_v12 = vadd.f32 %v1244_v22, %v969_v60  ;;  %v2459_v0 = vpop.f32.mrf.mxu0  ;;  %v1729_v7 = vadd.f32 %v1708_v46, %v1454_v36 }
 0x19e   : > { %v955_v50 = vpop.f32.mrf.mxu2  ;;  %v1457_v37 = vadd.f32 %v5479_v44, %v5493_v12 }
 0x19f   : > { %v970_v13 = vadd.f32 %v955_v50, %v621_v54 }
 0x1a3   : > { %v1246_v51 = vpop.f32.mrf.mxu3 }
 0x1a4   : > { %v5498_v56 = vadd.f32 %v1246_v51, %v970_v13  ;;  %v2461_v34 = vpop.f32.mrf.mxu0  ;;  %v1455_v13 = vadd.f32 %v5470_v63, %v5486_v42 }
 0x1a6   : > { %v958_v52 = vpop.f32.mrf.mxu2 }
 0x1a7   : > { %v971_v61 = vadd.f32 %v958_v52, %v624_v25 }
 0x1ab   : > { %v1249_v11 = vpop.f32.mrf.mxu3  ;;  %v1711_v3 = vpop.f32.mrf.mxu1 }
 0x1ac   : > { %v5501_v23 = vadd.f32 %v1249_v11, %v971_v61  ;;  %v2464_v22 = vpop.f32.mrf.mxu0  ;;  %v1730_v51 = vadd.f32 %v1711_v3, %v1455_v13 }
 0x1ae   : > { %v960_v39 = vpop.f32.mrf.mxu2 }
 0x1af   : > { %v972_v55 = vadd.f32 %v960_v39, %v626_v31 }
 0x1b3   : > { %v1251_v4 = vpop.f32.mrf.mxu3  ;;  %v1713_v54 = vpop.f32.mrf.mxu1 }
 0x1b4   : > { %v5505_v48 = vadd.f32 %v1251_v4, %v972_v55  ;;  %v1731_v55 = vadd.f32 %v1713_v54, %v1456_v14 }
 0x1b6   : > { %v1982_v6 = vpop.f32.mrf.mxu2 }
 0x1b7   : > { %v2007_v28 = vadd.f32 %v1982_v6, %v1726_v41 }
 0x1bb   : > { %v2179_v35 = vpop.f32.mrf.mxu3  ;;  %v1716_v39 = vpop.f32.mrf.mxu1 }
 0x1bc   : > { %v2204_v58 = vadd.f32 %v2179_v35, %v2007_v28  ;;  %v1732_v28 = vadd.f32 %v1716_v39, %v1457_v37 }
 0x1be   : > { %v2479_v16 = vadd.f32 %v2454_v10, %v2204_v58  ;;  %v1984_v62 = vpop.f32.mrf.mxu2  ;;  %v2466_v10 = vpop.f32.mrf.mxu0 }
 0x1bf   : > { %v2008_v57 = vadd.f32 %v1984_v62, %v1727_v45  ;;  %v1458_v45 = vadd.f32 %v5484_v43, %v5498_v56 }
 0x1c0   : > { %v2492_v1 = vadd.f32 %v5513_v20, %v2479_v16 }
 0x1c2   : > { %2502 = vst [vmem:[%s5518_s27] sm:$0xff] %v2492_v1 }
 0x1c3   : > { %v2181_v24 = vpop.f32.mrf.mxu3  ;;  %v1718_v33 = vpop.f32.mrf.mxu1 }
 0x1c4   : > { %v2205_v18 = vadd.f32 %v2181_v24, %v2008_v57  ;;  %v1733_v62 = vadd.f32 %v1718_v33, %v1458_v45 }
 0x1c6   : > { %v2480_v29 = vadd.f32 %v2456_v26, %v2205_v18  ;;  %v1987_v53 = vpop.f32.mrf.mxu2  ;;  %v2469_v6 = vpop.f32.mrf.mxu0  ;;  %v1459_v18 = vadd.f32 %v5491_v27, %v5501_v23 }
 0x1c7   : > { %v2009_v31 = vadd.f32 %v1987_v53, %v1728_v38 }
 0x1c8   : > { %v2493_v8 = vadd.f32 %v5513_v20, %v2480_v29 }
 0x1ca   : > { %2503 = vst [vmem:[%s5518_s27 + $0x8] sm:$0xff] %v2493_v8 }
 0x1cb   : > { %v2184_v2 = vpop.f32.mrf.mxu3  ;;  %v1721_v24 = vpop.f32.mrf.mxu1 }
 0x1cc   : > { %v2206_v9 = vadd.f32 %v2184_v2, %v2009_v31  ;;  %v1734_v29 = vadd.f32 %v1721_v24, %v1459_v18  ;;  %v1460_v2 = vadd.f32 %v5496_v40, %v5505_v48 }
 0x1ce   : > { %v2481_v15 = vadd.f32 %v2459_v0, %v2206_v9  ;;  %v1989_v47 = vpop.f32.mrf.mxu2  ;;  %v2471_v12 = vpop.f32.mrf.mxu0 }
 0x1cf   : > { %v2010_v60 = vadd.f32 %v1989_v47, %v1729_v7 }
 0x1d0   : > { %v2494_v5 = vadd.f32 %v5513_v20, %v2481_v15 }
 0x1d2   : > { %2504 = vst [vmem:[%s5518_s27 + $0x10] sm:$0xff] %v2494_v5 }
 0x1d3   : > { %v2186_v50 = vpop.f32.mrf.mxu3  ;;  %v1723_v31 = vpop.f32.mrf.mxu1 }
 0x1d4   : > { %v2207_v19 = vadd.f32 %v2186_v50, %v2010_v60  ;;  %v1735_v9 = vadd.f32 %v1723_v31, %v1460_v2 }
 0x1d6   : > { %v2482_v25 = vadd.f32 %v2461_v34, %v2207_v19  ;;  %v1992_v32 = vpop.f32.mrf.mxu2  ;;  %v2474_v8 = vpop.f32.mrf.mxu0 }
 0x1d7   : > { %v2011_v52 = vadd.f32 %v1992_v32, %v1730_v51 }
 0x1d8   : > { %v2495_v30 = vadd.f32 %v5513_v20, %v2482_v25 }
 0x1da   : > { %2505 = vst [vmem:[%s5518_s27 + $0x18] sm:$0xff] %v2495_v30 }
 0x1db   : > { %v2189_v61 = vpop.f32.mrf.mxu3 }
 0x1dc   : > { %v2208_v11 = vadd.f32 %v2189_v61, %v2011_v52 }
 0x1de   : > { %v2483_v4 = vadd.f32 %v2464_v22, %v2208_v11  ;;  %v1994_v63 = vpop.f32.mrf.mxu2  ;;  %v2476_v60 = vpop.f32.mrf.mxu0 }
 0x1df   : > { %v2012_v26 = vadd.f32 %v1994_v63, %v1731_v55 }
 0x1e0   : > { %v2496_v42 = vadd.f32 %v5513_v20, %v2483_v4 }
 0x1e2   : > { %2506 = vst [vmem:[%s5518_s27 + $0x20] sm:$0xff] %v2496_v42 }
 0x1e3   : > { %v2191_v49 = vpop.f32.mrf.mxu3 }
 0x1e4   : > { %v2209_v41 = vadd.f32 %v2191_v49, %v2012_v26 }
 0x1e6   : > { %v2484_v35 = vadd.f32 %v2466_v10, %v2209_v41  ;;  %v1997_v59 = vpop.f32.mrf.mxu2 }
 0x1e7   : > { %v2013_v58 = vadd.f32 %v1997_v59, %v1732_v28 }
 0x1e8   : > { %v2497_v21 = vadd.f32 %v5513_v20, %v2484_v35 }
 0x1ea   : > { %2507 = vst [vmem:[%s5518_s27 + $0x28] sm:$0xff] %v2497_v21 }
 0x1eb   : > { %v2194_v0 = vpop.f32.mrf.mxu3 }
 0x1ec   : > { %v2210_v16 = vadd.f32 %v2194_v0, %v2013_v58 }
 0x1ee   : > { %v2485_v46 = vadd.f32 %v2469_v6, %v2210_v16  ;;  %v1999_v44 = vpop.f32.mrf.mxu2 }
 0x1ef   : > { %v2014_v57 = vadd.f32 %v1999_v44, %v1733_v62 }
 0x1f0   : > { %v2498_v1 = vadd.f32 %v5513_v20, %v2485_v46 }
 0x1f2   : > { %2508 = vst [vmem:[%s5518_s27 + $0x30] sm:$0xff] %v2498_v1 }
 0x1f3   : > { %v2196_v17 = vpop.f32.mrf.mxu3 }
 0x1f4   : > { %v2211_v38 = vadd.f32 %v2196_v17, %v2014_v57 }
 0x1f6   : > { %v2486_v53 = vadd.f32 %v2471_v12, %v2211_v38  ;;  %v2002_v43 = vpop.f32.mrf.mxu2 }
 0x1f7   : > { %v2015_v34 = vadd.f32 %v2002_v43, %v1734_v29 }
 0x1f8   : > { %v2499_v56 = vadd.f32 %v5513_v20, %v2486_v53 }
 0x1fa   : > { %2509 = vst [vmem:[%s5518_s27 + $0x38] sm:$0xff] %v2499_v56 }
 0x1fb   : > { %v2199_v3 = vpop.f32.mrf.mxu3 }
 0x1fc   : > { %v2212_v36 = vadd.f32 %v2199_v3, %v2015_v34 }
 0x1fe   : > { %v2487_v7 = vadd.f32 %v2474_v8, %v2212_v36  ;;  %v2004_v27 = vpop.f32.mrf.mxu2 }
 0x1ff   : > { %v2016_v15 = vadd.f32 %v2004_v27, %v1735_v9 }
 0x200   : > { %v2500_v23 = vadd.f32 %v5513_v20, %v2487_v7 }
 0x202   : > { %2510 = vst [vmem:[%s5518_s27 + $0x40] sm:$0xff] %v2500_v23 }
 0x203   : > { %v2201_v47 = vpop.f32.mrf.mxu3 }
 0x204   : > { %v2213_v5 = vadd.f32 %v2201_v47, %v2016_v15 }
 0x206   : > { %v2488_v22 = vadd.f32 %v2476_v60, %v2213_v5 }
 0x208   : > { %v2501_v54 = vadd.f32 %v5513_v20, %v2488_v22 }
 0x20a   : > { %2511 = vst [vmem:[%s5518_s27 + $0x48] sm:$0xff] %v2501_v54 }
 0x20b PF: > { %s14_s15 = sadd.s32 1, %s3178_s15  }
 0x20c   : > { %p11_p4 = scmp.ge.s32.totalorder %s14_s15, 4  }
 0x20e   :  { %13 = sbr.rel (!%p11_p4) target bundleno = 1 (0x1), region = 74 }

</bundles_post_ra>
